<compile_context>
chip_gen: v7x
topology: tpu7x:2x2x1
jax: 0.10.0
libtpu: 0.0.40
codegen_flags: <defaults>
</compile_context>

<pallas_src>
import numpy as np
import jax
import jax.numpy as jnp
from jax import lax
from jax.experimental import pallas as pl
from jax.experimental.pallas import tpu as pltpu


# -----------------------------------------------------------------------------
# Banded ("Toeplitz") weight construction.  All stride-2 / SAME-pad / SAME-crop
# bookkeeping and all inter-layer re-layout is folded into these matrices, so the
# kernel body is just 2 MXU matmuls + bias + ReLU per layer.
#
# Activation layouts (per batch element) inside the fused kernel:
#   quad-row QR(S,C): row s, lane e*S*C + v*C + c  = x[4s+e, v, c]   (e = 0..3)
#   row-pair RP(S,C): row r, lane h*S*C + v*C + c  = x[2r+h, v, c]   (h = 0..1)
#   natural   N(S,C): row u, lane       v*C + c    = x[u,    v, c]
# SAME row padding is realised by zero rows in the VMEM scratch buffers; SAME
# column padding by dropping the corresponding weight taps.
# -----------------------------------------------------------------------------
def _enc1_band(w, S):
    """Stride-2 SAME conv reading a QR(S,Ci) input, writing an RP(S//2,Co) output.
    w: (Co, Ci, 3, 3) torch Conv2d weights."""
    w = np.asarray(w, np.float32)
    Co, Ci, k, _ = w.shape
    assert k == 3
    So = S // 2
    K, L = 4 * S * Ci, 2 * So * Co
    W = np.zeros((2, K, L), np.float32)
    for h in range(2):                               # output row phase in the pair
        for i in range(k):
            dr, e = divmod(2 * h + i, 4)             # input row 4r + 2h + i
            for j in range(k):
                for ow in range(So):
                    xc = 2 * ow + j
                    if xc >= S:                      # SAME right-pad column
                        continue
                    W[dr, e * S * Ci + xc * Ci:e * S * Ci + (xc + 1) * Ci,
                      h * So * Co + ow * Co:h * So * Co + (ow + 1) * Co] += w[:, :, i, j].T
    return W


def _enc2_band(w, S):
    """Stride-2 SAME conv reading an RP(S,Ci) input, writing a natural N(S//2,Co) output."""
    w = np.asarray(w, np.float32)
    Co, Ci, k, _ = w.shape
    assert k == 3
    So = S // 2
    K, L = 2 * S * Ci, So * Co
    W = np.zeros((2, K, L), np.float32)
    for i in range(k):
        dr, h = divmod(i, 2)                         # input row 2a + i
        for j in range(k):
            for ow in range(So):
                c = 2 * ow + j
                if c >= S:                           # SAME right-pad column
                    continue
                W[dr, h * S * Ci + c * Ci:h * S * Ci + (c + 1) * Ci,
                  ow * Co:(ow + 1) * Co] += w[:, :, i, j].T
    return W


def _dec1_band(w, S):
    """Stride-2, k=3, SAME-cropped transposed conv reading a natural N(S,Ci) input
    (stored under one zero pad row), writing an RP(2S,Co) output.
    w: (Ci, Co, 3, 3) torch ConvTranspose2d weights."""
    w = np.asarray(w, np.float32)
    Ci, Co, k, _ = w.shape
    assert k == 3
    K, L = S * Ci, 2 * (2 * S) * Co
    W = np.zeros((2, K, L), np.float32)
    for py in range(2):
        for dy in range(2):
            ty = 2 * dy + py
            if ty >= k:
                continue
            dr = 1 - dy
            for px in range(2):
                for dx in range(2):
                    tx = 2 * dx + px
                    if tx >= k:
                        continue
                    for v in range(S):
                        vs = v - dx
                        if vs < 0:                   # reads left pad -> zero tap
                            continue
                        lo = py * (2 * S * Co) + (2 * v + px) * Co
                        W[dr, vs * Ci:(vs + 1) * Ci, lo:lo + Co] += w[:, :, ty, tx]
    return W


def _dec2_band(w, S):
    """Stride-2, k=3, SAME-cropped transposed conv reading an RP(S,Ci) input
    (stored under one zero pad row), writing a QR(2S,Co) output."""
    w = np.asarray(w, np.float32)
    Ci, Co, k, _ = w.shape
    assert k == 3
    K, L = 2 * S * Ci, 4 * (2 * S) * Co
    W = np.zeros((2, K, L), np.float32)
    for e in range(4):                               # output row phase in the quad
        py, eh = e % 2, e // 2
        for dy in range(2):
            ty = 2 * dy + py
            if ty >= k:
                continue
            t = eh - dy                              # row-pair offset: -1, 0 or 1
            dr, h = (t + 2) // 2, (t + 2) % 2
            for px in range(2):
                for dx in range(2):
                    tx = 2 * dx + px
                    if tx >= k:
                        continue
                    for v in range(S):
                        vs = v - dx
                        if vs < 0:
                            continue
                        lo = e * (2 * S * Co) + (2 * v + px) * Co
                        W[dr, h * S * Ci + vs * Ci:h * S * Ci + (vs + 1) * Ci,
                          lo:lo + Co] += w[:, :, ty, tx]
    return W


def _num_parallel_cores():
    """2-wide 'parallel' grid on dual-TensorCore chips (v4/v5p megacore, v7x),
    a single grid step (batch folded into the body) on 1-TC v5e/v6e."""
    try:
        kind = jax.devices()[0].device_kind.lower()
    except Exception:
        return 1
    return 2 if any(t in kind for t in ("v4", "v5p", "7")) else 1


# -----------------------------------------------------------------------------
# Fused forward builder: everything static (weights, layouts, grid) is decided
# here, once; jit only ever sees the input array.
# -----------------------------------------------------------------------------
def make_fused_conv_ae(params, batch, height, width, compute_dtype=jnp.bfloat16):
    (w1, b1, k1), (w2, b2, k2) = params["enc"]
    (w3, b3, k3), (w4, b4, k4) = params["dec"]
    # TODO(synk): generalize banded-weight builders to other kernel sizes / strides.
    assert k1 == k2 == k3 == k4 == 3, "fused kernel built for 3x3, stride-2 layers"
    assert height == width and height % 4 == 0
    N, S0 = batch, height
    S1, S2 = S0 // 2, S0 // 4
    C0, C1, C2 = w1.shape[1], w1.shape[0], w2.shape[0]
    assert w3.shape[:2] == (C2, C1) and w4.shape[:2] == (C1, C0)

    # ---- banded weights & lane-broadcast biases (built ONCE, outside jit) ----
    Wb = [_enc1_band(w1, S0), _enc2_band(w2, S1), _dec1_band(w3, S2), _dec2_band(w4, S1)]
    Bb = [np.tile(np.asarray(b1, np.float32), 2 * S1)[None, :],
          np.tile(np.asarray(b2, np.float32), S2)[None, :],
          np.tile(np.asarray(b3, np.float32), 2 * (2 * S2))[None, :],
          np.tile(np.asarray(b4, np.float32), 4 * (2 * S1))[None, :]]
    w_c = [jnp.asarray(w, compute_dtype) for w in Wb]
    b_c = [jnp.asarray(b, jnp.float32) for b in Bb]

    G = _num_parallel_cores()
    if N % G != 0:
        G = 1
    NB = N // G

    # ---- static geometry ------------------------------------------------------
    qr_rows = S0 // 4 + 1                    # quad-row input rows  (incl. 1 zero row)
    K1 = 4 * S0 * C0                         # 256
    rp1_rows, L1 = S1 // 2 + 1, 2 * S1 * C1  # encoder-1 out (row-pair), 128 lanes
    n2_rows, L2 = S2 + 1, S2 * C2            # encoder-2 out (natural),   64 lanes
    rp3_rows, L3 = S2 + 1, 2 * (2 * S2) * C1 # decoder-1 out (row-pair), 128 lanes
    out_rows, L4 = S1 // 2, 4 * (2 * S1) * C0  # decoder-2 out (quad-row), 256 lanes
    R = S1 // 2                              # live matmul rows per layer (== S2)
    assert R == S2

    def kernel(x_ref, w1_ref, w2_ref, w3_ref, w4_ref,
               bb1, bb2, bb3, bb4, o_ref, a1, a2, a3):
        # The zero rows of the scratch buffers implement SAME row padding.
        a1[...] = jnp.zeros((NB, rp1_rows, L1), compute_dtype)
        a2[...] = jnp.zeros((NB, n2_rows, L2), compute_dtype)
        a3[...] = jnp.zeros((NB, rp3_rows, L3), compute_dtype)

        def band(lo, hi, w_ref, b_ref):
            acc = jnp.dot(lo, w_ref[0], preferred_element_type=jnp.float32)
            acc = acc + jnp.dot(hi, w_ref[1], preferred_element_type=jnp.float32)
            return jnp.maximum(acc + b_ref[...], 0.0)

        for b in range(NB):                  # static micro-batch loop: batch folded
            # encoder 1                      #   into one grid step on 1-TC chips
            h = band(x_ref[b, 0:R, :], x_ref[b, 1:R + 1, :], w1_ref, bb1)
            a1[b, 0:R, :] = h.astype(compute_dtype)
            # encoder 2
            h = band(a1[b, 0:R, :], a1[b, 1:R + 1, :], w2_ref, bb2)
            a2[b, 1:R + 1, :] = h.astype(compute_dtype)
            # decoder 1
            h = band(a2[b, 0:R, :], a2[b, 1:R + 1, :], w3_ref, bb3)
            a3[b, 1:R + 1, :] = h.astype(compute_dtype)
            # decoder 2 (256-lane dense store straight to the output block)
            h = band(a3[b, 0:R, :], a3[b, 1:R + 1, :], w4_ref, bb4)
            o_ref[b] = h.astype(jnp.float32)

    fused = pl.pallas_call(
        kernel,
        out_shape=jax.ShapeDtypeStruct((N, out_rows, L4), jnp.float32),
        grid_spec=pltpu.PrefetchScalarGridSpec(
            num_scalar_prefetch=0,
            grid=(G,),
            in_specs=[
                pl.BlockSpec((NB, qr_rows, K1), lambda g: (g, 0, 0)),
                pl.BlockSpec(Wb[0].shape, lambda g: (0, 0, 0)),
                pl.BlockSpec(Wb[1].shape, lambda g: (0, 0, 0)),
                pl.BlockSpec(Wb[2].shape, lambda g: (0, 0, 0)),
                pl.BlockSpec(Wb[3].shape, lambda g: (0, 0, 0)),
                pl.BlockSpec(Bb[0].shape, lambda g: (0, 0)),
                pl.BlockSpec(Bb[1].shape, lambda g: (0, 0)),
                pl.BlockSpec(Bb[2].shape, lambda g: (0, 0)),
                pl.BlockSpec(Bb[3].shape, lambda g: (0, 0)),
            ],
            out_specs=pl.BlockSpec((NB, out_rows, L4), lambda g: (g, 0, 0)),
            scratch_shapes=[
                pltpu.VMEM((NB, rp1_rows, L1), compute_dtype),
                pltpu.VMEM((NB, n2_rows, L2), compute_dtype),
                pltpu.VMEM((NB, rp3_rows, L3), compute_dtype),
            ],
        ),
        compiler_params=pltpu.CompilerParams(dimension_semantics=("parallel",)),
    )

    def apply(x_nchw):
        # NCHW -> NHWC, append zero rows, quad-row fold (contiguity-preserving reshape)
        x = jnp.transpose(x_nchw, (0, 2, 3, 1)).astype(compute_dtype)
        x = jnp.pad(x, ((0, 0), (0, 4 * qr_rows - S0), (0, 0), (0, 0)))
        x = x.reshape(N, qr_rows, K1)
        y = fused(x, *w_c, *b_c)                          # (N, S0/4, 4*S0*C0) f32
        y = y.reshape(N, S0, S0, C0)                      # quad-row unfold
        return jnp.transpose(y, (0, 3, 1, 2))             # NHWC -> NCHW

    return apply


# -----------------------------------------------------------------------------
# Parameters and a plain-XLA (f32, HIGHEST precision) reference for validation.
# -----------------------------------------------------------------------------
def init_conv_ae_params(key, channels, kernels):
    enc, dec = [], []
    rev_c = list(reversed(channels))
    rev_k = list(reversed(kernels))
    for i in range(1, len(channels)):
        key, k1, k2 = jax.random.split(key, 3)
        cin, cout, k = channels[i - 1], channels[i], kernels[i - 1]
        w = jax.random.normal(k1, (cout, cin, k, k), jnp.float32) * 0.1
        b = jax.random.normal(k2, (cout,), jnp.float32) * 0.01
        enc.append((w, b, k))
    for i in range(len(rev_c) - 1):
        key, k1, k2 = jax.random.split(key, 3)
        cin, cout, k = rev_c[i], rev_c[i + 1], rev_k[i]
        w = jax.random.normal(k1, (cin, cout, k, k), jnp.float32) * 0.1  # (in, out, kH, kW)
        b = jax.random.normal(k2, (cout,), jnp.float32) * 0.01
        dec.append((w, b, k))
    return {"enc": enc, "dec": dec}


def _ref_enc(h, w, b, k):
    N, H, W, Ci = h.shape
    s = 2
    out_h, out_w = -(-H // s), -(-W // s)
    ph = max((out_h - 1) * s + k - H, 0)
    pw = max((out_w - 1) * s + k - W, 0)
    top, left = ph // 2, pw // 2
    y = lax.conv_general_dilated(
        h, jnp.transpose(w, (2, 3, 1, 0)), (s, s),
        ((top, ph - top), (left, pw - left)),
        dimension_numbers=("NHWC", "HWIO", "NHWC"),
        precision=lax.Precision.HIGHEST)
    return jax.nn.relu(y + b)


def _ref_dec(h, w, b, k):
    s = 2
    wc = jnp.transpose(w, (2, 3, 0, 1))[::-1, ::-1, :, :]
    y = lax.conv_general_dilated(
        h, wc, (1, 1), ((k - 1, k - 1), (k - 1, k - 1)),
        lhs_dilation=(s, s), dimension_numbers=("NHWC", "HWIO", "NHWC"),
        precision=lax.Precision.HIGHEST)
    y = jax.nn.relu(y + b)
    crop = k - s
    top, left = crop // 2, crop // 2
    Hf, Wf = y.shape[1], y.shape[2]
    return y[:, top:Hf - (crop - top), left:Wf - (crop - left), :]


def reference_forward(params, x_nchw):
    h = jnp.transpose(x_nchw, (0, 2, 3, 1)).astype(jnp.float32)
    for (w, b, k) in params["enc"]:
        h = _ref_enc(h, w, b, k)
    for (w, b, k) in params["dec"]:
        h = _ref_dec(h, w, b, k)
    return jnp.transpose(h, (0, 3, 1, 2))


if __name__ == "__main__":
    channels = [4, 8, 16]
    kernels = [3, 3]
    N, C, H, W = 2, channels[0], 16, 16

    key = jax.random.PRNGKey(0)
    key, xkey = jax.random.split(key)
    x = jax.random.normal(xkey, (N, C, H, W), jnp.float32)
    params = init_conv_ae_params(key, channels, kernels)

    fwd = jax.jit(make_fused_conv_ae(params, N, H, W))   # only arrays cross jit
    out = jax.block_until_ready(fwd(x))

    assert out.shape == (N, C, H, W), f"unexpected output shape {out.shape}"
    assert bool(jnp.all(out >= 0.0)), "final ReLU violated"

    # numerical check vs plain-XLA f32/HIGHEST reference (bf16 operands -> 3e-2 tol)
    ref = jax.block_until_ready(reference_forward(params, x))
    np.testing.assert_allclose(np.asarray(out), np.asarray(ref), rtol=3e-2, atol=3e-2)

    print("KERNEL_OK")
</pallas_src>

<mosaic_0001>
module attributes {stable_mosaic.version = 11 : i64} {
  func.func @kernel(%arg0: i32, %arg1: memref<2x5x256xbf16, #tpu.memory_space<vmem>>, %arg2: memref<2x256x128xbf16, #tpu.memory_space<vmem>>, %arg3: memref<2x128x64xbf16, #tpu.memory_space<vmem>>, %arg4: memref<2x64x128xbf16, #tpu.memory_space<vmem>>, %arg5: memref<2x128x256xbf16, #tpu.memory_space<vmem>>, %arg6: memref<1x128xf32, #tpu.memory_space<vmem>>, %arg7: memref<1x64xf32, #tpu.memory_space<vmem>>, %arg8: memref<1x128xf32, #tpu.memory_space<vmem>>, %arg9: memref<1x256xf32, #tpu.memory_space<vmem>>, %arg10: memref<2x4x256xf32, #tpu.memory_space<vmem>>, %arg11: memref<2x5x128xbf16, #tpu.memory_space<vmem>>, %arg12: memref<2x5x64xbf16, #tpu.memory_space<vmem>>, %arg13: memref<2x5x128xbf16, #tpu.memory_space<vmem>>) attributes {dimension_semantics = [#tpu.dimension_semantics<parallel>], iteration_bounds = array<i64: 1>, scalar_prefetch = 0 : i64, scratch_operands = 3 : i64, tpu.core_type = #tpu.core_type<tc>, window_params = [{transform_indices = @transform_0, window_bounds = array<i64: 2, 5, 256>}, {pipeline_mode = #tpu.pipeline_mode<synchronous>, transform_indices = @transform_1, window_bounds = array<i64: 2, 256, 128>}, {pipeline_mode = #tpu.pipeline_mode<synchronous>, transform_indices = @transform_2, window_bounds = array<i64: 2, 128, 64>}, {pipeline_mode = #tpu.pipeline_mode<synchronous>, transform_indices = @transform_3, window_bounds = array<i64: 2, 64, 128>}, {pipeline_mode = #tpu.pipeline_mode<synchronous>, transform_indices = @transform_4, window_bounds = array<i64: 2, 128, 256>}, {pipeline_mode = #tpu.pipeline_mode<synchronous>, transform_indices = @transform_5, window_bounds = array<i64: 1, 128>}, {pipeline_mode = #tpu.pipeline_mode<synchronous>, transform_indices = @transform_6, window_bounds = array<i64: 1, 64>}, {pipeline_mode = #tpu.pipeline_mode<synchronous>, transform_indices = @transform_7, window_bounds = array<i64: 1, 128>}, {pipeline_mode = #tpu.pipeline_mode<synchronous>, transform_indices = @transform_8, window_bounds = array<i64: 1, 256>}, {transform_indices = @transform_9, window_bounds = array<i64: 2, 4, 256>}]} {
    %cst = arith.constant 0.000000e+00 : bf16
    %0 = vector.broadcast %cst : bf16 to vector<2x5x128xbf16>
    %c0 = arith.constant 0 : index
    %c0_0 = arith.constant 0 : index
    %c0_1 = arith.constant 0 : index
    %1 = vector.load %arg11[%c0, %c0_0, %c0_1] : memref<2x5x128xbf16, #tpu.memory_space<vmem>>, vector<2x5x128xbf16>
    tpu.vector_store %arg11[%c0, %c0_0, %c0_1], %0 {strides = array<i32>} : memref<2x5x128xbf16, #tpu.memory_space<vmem>>, vector<2x5x128xbf16>,
    %cst_2 = arith.constant 0.000000e+00 : bf16
    %2 = vector.broadcast %cst_2 : bf16 to vector<2x5x64xbf16>
    %c0_3 = arith.constant 0 : index
    %c0_4 = arith.constant 0 : index
    %c0_5 = arith.constant 0 : index
    %3 = vector.load %arg12[%c0_3, %c0_4, %c0_5] : memref<2x5x64xbf16, #tpu.memory_space<vmem>>, vector<2x5x64xbf16>
    tpu.vector_store %arg12[%c0_3, %c0_4, %c0_5], %2 {strides = array<i32>} : memref<2x5x64xbf16, #tpu.memory_space<vmem>>, vector<2x5x64xbf16>,
    %cst_6 = arith.constant 0.000000e+00 : bf16
    %4 = vector.broadcast %cst_6 : bf16 to vector<2x5x128xbf16>
    %c0_7 = arith.constant 0 : index
    %c0_8 = arith.constant 0 : index
    %c0_9 = arith.constant 0 : index
    %5 = vector.load %arg13[%c0_7, %c0_8, %c0_9] : memref<2x5x128xbf16, #tpu.memory_space<vmem>>, vector<2x5x128xbf16>
    tpu.vector_store %arg13[%c0_7, %c0_8, %c0_9], %4 {strides = array<i32>} : memref<2x5x128xbf16, #tpu.memory_space<vmem>>, vector<2x5x128xbf16>,
    %c0_10 = arith.constant 0 : index
    %c0_11 = arith.constant 0 : index
    %c0_12 = arith.constant 0 : index
    %6 = vector.load %arg1[%c0_10, %c0_11, %c0_12] : memref<2x5x256xbf16, #tpu.memory_space<vmem>>, vector<1x4x256xbf16>
    %7 = vector.shape_cast %6 : vector<1x4x256xbf16> to vector<4x256xbf16>
    %c0_13 = arith.constant 0 : index
    %c1 = arith.constant 1 : index
    %c0_14 = arith.constant 0 : index
    %8 = vector.load %arg1[%c0_13, %c1, %c0_14] : memref<2x5x256xbf16, #tpu.memory_space<vmem>>, vector<1x4x256xbf16>
    %9 = vector.shape_cast %8 : vector<1x4x256xbf16> to vector<4x256xbf16>
    %c0_15 = arith.constant 0 : index
    %c0_16 = arith.constant 0 : index
    %c0_17 = arith.constant 0 : index
    %10 = vector.load %arg2[%c0_15, %c0_16, %c0_17] : memref<2x256x128xbf16, #tpu.memory_space<vmem>>, vector<1x256x128xbf16>
    %11 = vector.shape_cast %10 : vector<1x256x128xbf16> to vector<256x128xbf16>
    %cst_18 = arith.constant dense<0.000000e+00> : vector<4x128xf32>
    %12 = tpu.matmul %7, %11, %cst_18 {dimension_numbers = #tpu.dot_dimension_numbers<[1], [0], [0], [1], [0, 0, 1, 1], [], []>} : vector<4x256xbf16>, vector<256x128xbf16>, vector<4x128xf32> -> vector<4x128xf32>
    %c1_19 = arith.constant 1 : index
    %c0_20 = arith.constant 0 : index
    %c0_21 = arith.constant 0 : index
    %13 = vector.load %arg2[%c1_19, %c0_20, %c0_21] : memref<2x256x128xbf16, #tpu.memory_space<vmem>>, vector<1x256x128xbf16>
    %14 = vector.shape_cast %13 : vector<1x256x128xbf16> to vector<256x128xbf16>
    %cst_22 = arith.constant dense<0.000000e+00> : vector<4x128xf32>
    %15 = tpu.matmul %9, %14, %cst_22 {dimension_numbers = #tpu.dot_dimension_numbers<[1], [0], [0], [1], [0, 0, 1, 1], [], []>} : vector<4x256xbf16>, vector<256x128xbf16>, vector<4x128xf32> -> vector<4x128xf32>
    %16 = arith.addf %12, %15 : vector<4x128xf32>
    %c0_23 = arith.constant 0 : index
    %c0_24 = arith.constant 0 : index
    %17 = vector.load %arg6[%c0_23, %c0_24] : memref<1x128xf32, #tpu.memory_space<vmem>>, vector<1x128xf32>
    %18 = vector.broadcast %17 : vector<1x128xf32> to vector<4x128xf32>
    %19 = arith.addf %16, %18 : vector<4x128xf32>
    %cst_25 = arith.constant 0.000000e+00 : f32
    %20 = vector.broadcast %cst_25 : f32 to vector<4x128xf32>
    %21 = arith.maximumf %19, %20 : vector<4x128xf32>
    %22 = arith.truncf %21 : vector<4x128xf32> to vector<4x128xbf16>
    %c0_26 = arith.constant 0 : index
    %c0_27 = arith.constant 0 : index
    %c0_28 = arith.constant 0 : index
    %23 = vector.load %arg11[%c0_26, %c0_27, %c0_28] : memref<2x5x128xbf16, #tpu.memory_space<vmem>>, vector<1x4x128xbf16>
    %24 = vector.shape_cast %23 : vector<1x4x128xbf16> to vector<4x128xbf16>
    %25 = vector.shape_cast %22 : vector<4x128xbf16> to vector<1x4x128xbf16>
    tpu.vector_store %arg11[%c0_26, %c0_27, %c0_28], %25 {strides = array<i32>} : memref<2x5x128xbf16, #tpu.memory_space<vmem>>, vector<1x4x128xbf16>,
    %c0_29 = arith.constant 0 : index
    %c0_30 = arith.constant 0 : index
    %c0_31 = arith.constant 0 : index
    %26 = vector.load %arg11[%c0_29, %c0_30, %c0_31] : memref<2x5x128xbf16, #tpu.memory_space<vmem>>, vector<1x4x128xbf16>
    %27 = vector.shape_cast %26 : vector<1x4x128xbf16> to vector<4x128xbf16>
    %c0_32 = arith.constant 0 : index
    %c1_33 = arith.constant 1 : index
    %c0_34 = arith.constant 0 : index
    %28 = vector.load %arg11[%c0_32, %c1_33, %c0_34] : memref<2x5x128xbf16, #tpu.memory_space<vmem>>, vector<1x4x128xbf16>
    %29 = vector.shape_cast %28 : vector<1x4x128xbf16> to vector<4x128xbf16>
    %c0_35 = arith.constant 0 : index
    %c0_36 = arith.constant 0 : index
    %c0_37 = arith.constant 0 : index
    %30 = vector.load %arg3[%c0_35, %c0_36, %c0_37] : memref<2x128x64xbf16, #tpu.memory_space<vmem>>, vector<1x128x64xbf16>
    %31 = vector.shape_cast %30 : vector<1x128x64xbf16> to vector<128x64xbf16>
    %cst_38 = arith.constant dense<0.000000e+00> : vector<4x64xf32>
    %32 = tpu.matmul %27, %31, %cst_38 {dimension_numbers = #tpu.dot_dimension_numbers<[1], [0], [0], [1], [0, 0, 1, 1], [], []>} : vector<4x128xbf16>, vector<128x64xbf16>, vector<4x64xf32> -> vector<4x64xf32>
    %c1_39 = arith.constant 1 : index
    %c0_40 = arith.constant 0 : index
    %c0_41 = arith.constant 0 : index
    %33 = vector.load %arg3[%c1_39, %c0_40, %c0_41] : memref<2x128x64xbf16, #tpu.memory_space<vmem>>, vector<1x128x64xbf16>
    %34 = vector.shape_cast %33 : vector<1x128x64xbf16> to vector<128x64xbf16>
    %cst_42 = arith.constant dense<0.000000e+00> : vector<4x64xf32>
    %35 = tpu.matmul %29, %34, %cst_42 {dimension_numbers = #tpu.dot_dimension_numbers<[1], [0], [0], [1], [0, 0, 1, 1], [], []>} : vector<4x128xbf16>, vector<128x64xbf16>, vector<4x64xf32> -> vector<4x64xf32>
    %36 = arith.addf %32, %35 : vector<4x64xf32>
    %c0_43 = arith.constant 0 : index
    %c0_44 = arith.constant 0 : index
    %37 = vector.load %arg7[%c0_43, %c0_44] : memref<1x64xf32, #tpu.memory_space<vmem>>, vector<1x64xf32>
    %38 = vector.broadcast %37 : vector<1x64xf32> to vector<4x64xf32>
    %39 = arith.addf %36, %38 : vector<4x64xf32>
    %cst_45 = arith.constant 0.000000e+00 : f32
    %40 = vector.broadcast %cst_45 : f32 to vector<4x64xf32>
    %41 = arith.maximumf %39, %40 : vector<4x64xf32>
    %42 = arith.truncf %41 : vector<4x64xf32> to vector<4x64xbf16>
    %c0_46 = arith.constant 0 : index
    %c1_47 = arith.constant 1 : index
    %c0_48 = arith.constant 0 : index
    %43 = vector.load %arg12[%c0_46, %c1_47, %c0_48] : memref<2x5x64xbf16, #tpu.memory_space<vmem>>, vector<1x4x64xbf16>
    %44 = vector.shape_cast %43 : vector<1x4x64xbf16> to vector<4x64xbf16>
    %45 = vector.shape_cast %42 : vector<4x64xbf16> to vector<1x4x64xbf16>
    tpu.vector_store %arg12[%c0_46, %c1_47, %c0_48], %45 {strides = array<i32>} : memref<2x5x64xbf16, #tpu.memory_space<vmem>>, vector<1x4x64xbf16>,
    %c0_49 = arith.constant 0 : index
    %c0_50 = arith.constant 0 : index
    %c0_51 = arith.constant 0 : index
    %46 = vector.load %arg12[%c0_49, %c0_50, %c0_51] : memref<2x5x64xbf16, #tpu.memory_space<vmem>>, vector<1x4x64xbf16>
    %47 = vector.shape_cast %46 : vector<1x4x64xbf16> to vector<4x64xbf16>
    %c0_52 = arith.constant 0 : index
    %c1_53 = arith.constant 1 : index
    %c0_54 = arith.constant 0 : index
    %48 = vector.load %arg12[%c0_52, %c1_53, %c0_54] : memref<2x5x64xbf16, #tpu.memory_space<vmem>>, vector<1x4x64xbf16>
    %49 = vector.shape_cast %48 : vector<1x4x64xbf16> to vector<4x64xbf16>
    %c0_55 = arith.constant 0 : index
    %c0_56 = arith.constant 0 : index
    %c0_57 = arith.constant 0 : index
    %50 = vector.load %arg4[%c0_55, %c0_56, %c0_57] : memref<2x64x128xbf16, #tpu.memory_space<vmem>>, vector<1x64x128xbf16>
    %51 = vector.shape_cast %50 : vector<1x64x128xbf16> to vector<64x128xbf16>
    %cst_58 = arith.constant dense<0.000000e+00> : vector<4x128xf32>
    %52 = tpu.matmul %47, %51, %cst_58 {dimension_numbers = #tpu.dot_dimension_numbers<[1], [0], [0], [1], [0, 0, 1, 1], [], []>} : vector<4x64xbf16>, vector<64x128xbf16>, vector<4x128xf32> -> vector<4x128xf32>
    %c1_59 = arith.constant 1 : index
    %c0_60 = arith.constant 0 : index
    %c0_61 = arith.constant 0 : index
    %53 = vector.load %arg4[%c1_59, %c0_60, %c0_61] : memref<2x64x128xbf16, #tpu.memory_space<vmem>>, vector<1x64x128xbf16>
    %54 = vector.shape_cast %53 : vector<1x64x128xbf16> to vector<64x128xbf16>
    %cst_62 = arith.constant dense<0.000000e+00> : vector<4x128xf32>
    %55 = tpu.matmul %49, %54, %cst_62 {dimension_numbers = #tpu.dot_dimension_numbers<[1], [0], [0], [1], [0, 0, 1, 1], [], []>} : vector<4x64xbf16>, vector<64x128xbf16>, vector<4x128xf32> -> vector<4x128xf32>
    %56 = arith.addf %52, %55 : vector<4x128xf32>
    %c0_63 = arith.constant 0 : index
    %c0_64 = arith.constant 0 : index
    %57 = vector.load %arg8[%c0_63, %c0_64] : memref<1x128xf32, #tpu.memory_space<vmem>>, vector<1x128xf32>
    %58 = vector.broadcast %57 : vector<1x128xf32> to vector<4x128xf32>
    %59 = arith.addf %56, %58 : vector<4x128xf32>
    %cst_65 = arith.constant 0.000000e+00 : f32
    %60 = vector.broadcast %cst_65 : f32 to vector<4x128xf32>
    %61 = arith.maximumf %59, %60 : vector<4x128xf32>
    %62 = arith.truncf %61 : vector<4x128xf32> to vector<4x128xbf16>
    %c0_66 = arith.constant 0 : index
    %c1_67 = arith.constant 1 : index
    %c0_68 = arith.constant 0 : index
    %63 = vector.load %arg13[%c0_66, %c1_67, %c0_68] : memref<2x5x128xbf16, #tpu.memory_space<vmem>>, vector<1x4x128xbf16>
    %64 = vector.shape_cast %63 : vector<1x4x128xbf16> to vector<4x128xbf16>
    %65 = vector.shape_cast %62 : vector<4x128xbf16> to vector<1x4x128xbf16>
    tpu.vector_store %arg13[%c0_66, %c1_67, %c0_68], %65 {strides = array<i32>} : memref<2x5x128xbf16, #tpu.memory_space<vmem>>, vector<1x4x128xbf16>,
    %c0_69 = arith.constant 0 : index
    %c0_70 = arith.constant 0 : index
    %c0_71 = arith.constant 0 : index
    %66 = vector.load %arg13[%c0_69, %c0_70, %c0_71] : memref<2x5x128xbf16, #tpu.memory_space<vmem>>, vector<1x4x128xbf16>
    %67 = vector.shape_cast %66 : vector<1x4x128xbf16> to vector<4x128xbf16>
    %c0_72 = arith.constant 0 : index
    %c1_73 = arith.constant 1 : index
    %c0_74 = arith.constant 0 : index
    %68 = vector.load %arg13[%c0_72, %c1_73, %c0_74] : memref<2x5x128xbf16, #tpu.memory_space<vmem>>, vector<1x4x128xbf16>
    %69 = vector.shape_cast %68 : vector<1x4x128xbf16> to vector<4x128xbf16>
    %c0_75 = arith.constant 0 : index
    %c0_76 = arith.constant 0 : index
    %c0_77 = arith.constant 0 : index
    %70 = vector.load %arg5[%c0_75, %c0_76, %c0_77] : memref<2x128x256xbf16, #tpu.memory_space<vmem>>, vector<1x128x256xbf16>
    %71 = vector.shape_cast %70 : vector<1x128x256xbf16> to vector<128x256xbf16>
    %cst_78 = arith.constant dense<0.000000e+00> : vector<4x256xf32>
    %72 = tpu.matmul %67, %71, %cst_78 {dimension_numbers = #tpu.dot_dimension_numbers<[1], [0], [0], [1], [0, 0, 1, 1], [], []>} : vector<4x128xbf16>, vector<128x256xbf16>, vector<4x256xf32> -> vector<4x256xf32>
    %c1_79 = arith.constant 1 : index
    %c0_80 = arith.constant 0 : index
    %c0_81 = arith.constant 0 : index
    %73 = vector.load %arg5[%c1_79, %c0_80, %c0_81] : memref<2x128x256xbf16, #tpu.memory_space<vmem>>, vector<1x128x256xbf16>
    %74 = vector.shape_cast %73 : vector<1x128x256xbf16> to vector<128x256xbf16>
    %cst_82 = arith.constant dense<0.000000e+00> : vector<4x256xf32>
    %75 = tpu.matmul %69, %74, %cst_82 {dimension_numbers = #tpu.dot_dimension_numbers<[1], [0], [0], [1], [0, 0, 1, 1], [], []>} : vector<4x128xbf16>, vector<128x256xbf16>, vector<4x256xf32> -> vector<4x256xf32>
    %76 = arith.addf %72, %75 : vector<4x256xf32>
    %c0_83 = arith.constant 0 : index
    %c0_84 = arith.constant 0 : index
    %77 = vector.load %arg9[%c0_83, %c0_84] : memref<1x256xf32, #tpu.memory_space<vmem>>, vector<1x256xf32>
    %78 = vector.broadcast %77 : vector<1x256xf32> to vector<4x256xf32>
    %79 = arith.addf %76, %78 : vector<4x256xf32>
    %cst_85 = arith.constant 0.000000e+00 : f32
    %80 = vector.broadcast %cst_85 : f32 to vector<4x256xf32>
    %81 = arith.maximumf %79, %80 : vector<4x256xf32>
    %c0_86 = arith.constant 0 : index
    %c0_87 = arith.constant 0 : index
    %c0_88 = arith.constant 0 : index
    %82 = vector.load %arg10[%c0_86, %c0_87, %c0_88] : memref<2x4x256xf32, #tpu.memory_space<vmem>>, vector<1x4x256xf32>
    %83 = vector.shape_cast %82 : vector<1x4x256xf32> to vector<4x256xf32>
    %84 = vector.shape_cast %81 : vector<4x256xf32> to vector<1x4x256xf32>
    tpu.vector_store %arg10[%c0_86, %c0_87, %c0_88], %84 {strides = array<i32>} : memref<2x4x256xf32, #tpu.memory_space<vmem>>, vector<1x4x256xf32>,
    %c1_89 = arith.constant 1 : index
    %c0_90 = arith.constant 0 : index
    %c0_91 = arith.constant 0 : index
    %85 = vector.load %arg1[%c1_89, %c0_90, %c0_91] : memref<2x5x256xbf16, #tpu.memory_space<vmem>>, vector<1x4x256xbf16>
    %86 = vector.shape_cast %85 : vector<1x4x256xbf16> to vector<4x256xbf16>
    %c1_92 = arith.constant 1 : index
    %c1_93 = arith.constant 1 : index
    %c0_94 = arith.constant 0 : index
    %87 = vector.load %arg1[%c1_92, %c1_93, %c0_94] : memref<2x5x256xbf16, #tpu.memory_space<vmem>>, vector<1x4x256xbf16>
    %88 = vector.shape_cast %87 : vector<1x4x256xbf16> to vector<4x256xbf16>
    %c0_95 = arith.constant 0 : index
    %c0_96 = arith.constant 0 : index
    %c0_97 = arith.constant 0 : index
    %89 = vector.load %arg2[%c0_95, %c0_96, %c0_97] : memref<2x256x128xbf16, #tpu.memory_space<vmem>>, vector<1x256x128xbf16>
    %90 = vector.shape_cast %89 : vector<1x256x128xbf16> to vector<256x128xbf16>
    %cst_98 = arith.constant dense<0.000000e+00> : vector<4x128xf32>
    %91 = tpu.matmul %86, %90, %cst_98 {dimension_numbers = #tpu.dot_dimension_numbers<[1], [0], [0], [1], [0, 0, 1, 1], [], []>} : vector<4x256xbf16>, vector<256x128xbf16>, vector<4x128xf32> -> vector<4x128xf32>
    %c1_99 = arith.constant 1 : index
    %c0_100 = arith.constant 0 : index
    %c0_101 = arith.constant 0 : index
    %92 = vector.load %arg2[%c1_99, %c0_100, %c0_101] : memref<2x256x128xbf16, #tpu.memory_space<vmem>>, vector<1x256x128xbf16>
    %93 = vector.shape_cast %92 : vector<1x256x128xbf16> to vector<256x128xbf16>
    %cst_102 = arith.constant dense<0.000000e+00> : vector<4x128xf32>
    %94 = tpu.matmul %88, %93, %cst_102 {dimension_numbers = #tpu.dot_dimension_numbers<[1], [0], [0], [1], [0, 0, 1, 1], [], []>} : vector<4x256xbf16>, vector<256x128xbf16>, vector<4x128xf32> -> vector<4x128xf32>
    %95 = arith.addf %91, %94 : vector<4x128xf32>
    %c0_103 = arith.constant 0 : index
    %c0_104 = arith.constant 0 : index
    %96 = vector.load %arg6[%c0_103, %c0_104] : memref<1x128xf32, #tpu.memory_space<vmem>>, vector<1x128xf32>
    %97 = vector.broadcast %96 : vector<1x128xf32> to vector<4x128xf32>
    %98 = arith.addf %95, %97 : vector<4x128xf32>
    %cst_105 = arith.constant 0.000000e+00 : f32
    %99 = vector.broadcast %cst_105 : f32 to vector<4x128xf32>
    %100 = arith.maximumf %98, %99 : vector<4x128xf32>
    %101 = arith.truncf %100 : vector<4x128xf32> to vector<4x128xbf16>
    %c1_106 = arith.constant 1 : index
    %c0_107 = arith.constant 0 : index
    %c0_108 = arith.constant 0 : index
    %102 = vector.load %arg11[%c1_106, %c0_107, %c0_108] : memref<2x5x128xbf16, #tpu.memory_space<vmem>>, vector<1x4x128xbf16>
    %103 = vector.shape_cast %102 : vector<1x4x128xbf16> to vector<4x128xbf16>
    %104 = vector.shape_cast %101 : vector<4x128xbf16> to vector<1x4x128xbf16>
    tpu.vector_store %arg11[%c1_106, %c0_107, %c0_108], %104 {strides = array<i32>} : memref<2x5x128xbf16, #tpu.memory_space<vmem>>, vector<1x4x128xbf16>,
    %c1_109 = arith.constant 1 : index
    %c0_110 = arith.constant 0 : index
    %c0_111 = arith.constant 0 : index
    %105 = vector.load %arg11[%c1_109, %c0_110, %c0_111] : memref<2x5x128xbf16, #tpu.memory_space<vmem>>, vector<1x4x128xbf16>
    %106 = vector.shape_cast %105 : vector<1x4x128xbf16> to vector<4x128xbf16>
    %c1_112 = arith.constant 1 : index
    %c1_113 = arith.constant 1 : index
    %c0_114 = arith.constant 0 : index
    %107 = vector.load %arg11[%c1_112, %c1_113, %c0_114] : memref<2x5x128xbf16, #tpu.memory_space<vmem>>, vector<1x4x128xbf16>
    %108 = vector.shape_cast %107 : vector<1x4x128xbf16> to vector<4x128xbf16>
    %c0_115 = arith.constant 0 : index
    %c0_116 = arith.constant 0 : index
    %c0_117 = arith.constant 0 : index
    %109 = vector.load %arg3[%c0_115, %c0_116, %c0_117] : memref<2x128x64xbf16, #tpu.memory_space<vmem>>, vector<1x128x64xbf16>
    %110 = vector.shape_cast %109 : vector<1x128x64xbf16> to vector<128x64xbf16>
    %cst_118 = arith.constant dense<0.000000e+00> : vector<4x64xf32>
    %111 = tpu.matmul %106, %110, %cst_118 {dimension_numbers = #tpu.dot_dimension_numbers<[1], [0], [0], [1], [0, 0, 1, 1], [], []>} : vector<4x128xbf16>, vector<128x64xbf16>, vector<4x64xf32> -> vector<4x64xf32>
    %c1_119 = arith.constant 1 : index
    %c0_120 = arith.constant 0 : index
    %c0_121 = arith.constant 0 : index
    %112 = vector.load %arg3[%c1_119, %c0_120, %c0_121] : memref<2x128x64xbf16, #tpu.memory_space<vmem>>, vector<1x128x64xbf16>
    %113 = vector.shape_cast %112 : vector<1x128x64xbf16> to vector<128x64xbf16>
    %cst_122 = arith.constant dense<0.000000e+00> : vector<4x64xf32>
    %114 = tpu.matmul %108, %113, %cst_122 {dimension_numbers = #tpu.dot_dimension_numbers<[1], [0], [0], [1], [0, 0, 1, 1], [], []>} : vector<4x128xbf16>, vector<128x64xbf16>, vector<4x64xf32> -> vector<4x64xf32>
    %115 = arith.addf %111, %114 : vector<4x64xf32>
    %c0_123 = arith.constant 0 : index
    %c0_124 = arith.constant 0 : index
    %116 = vector.load %arg7[%c0_123, %c0_124] : memref<1x64xf32, #tpu.memory_space<vmem>>, vector<1x64xf32>
    %117 = vector.broadcast %116 : vector<1x64xf32> to vector<4x64xf32>
    %118 = arith.addf %115, %117 : vector<4x64xf32>
    %cst_125 = arith.constant 0.000000e+00 : f32
    %119 = vector.broadcast %cst_125 : f32 to vector<4x64xf32>
    %120 = arith.maximumf %118, %119 : vector<4x64xf32>
    %121 = arith.truncf %120 : vector<4x64xf32> to vector<4x64xbf16>
    %c1_126 = arith.constant 1 : index
    %c1_127 = arith.constant 1 : index
    %c0_128 = arith.constant 0 : index
    %122 = vector.load %arg12[%c1_126, %c1_127, %c0_128] : memref<2x5x64xbf16, #tpu.memory_space<vmem>>, vector<1x4x64xbf16>
    %123 = vector.shape_cast %122 : vector<1x4x64xbf16> to vector<4x64xbf16>
    %124 = vector.shape_cast %121 : vector<4x64xbf16> to vector<1x4x64xbf16>
    tpu.vector_store %arg12[%c1_126, %c1_127, %c0_128], %124 {strides = array<i32>} : memref<2x5x64xbf16, #tpu.memory_space<vmem>>, vector<1x4x64xbf16>,
    %c1_129 = arith.constant 1 : index
    %c0_130 = arith.constant 0 : index
    %c0_131 = arith.constant 0 : index
    %125 = vector.load %arg12[%c1_129, %c0_130, %c0_131] : memref<2x5x64xbf16, #tpu.memory_space<vmem>>, vector<1x4x64xbf16>
    %126 = vector.shape_cast %125 : vector<1x4x64xbf16> to vector<4x64xbf16>
    %c1_132 = arith.constant 1 : index
    %c1_133 = arith.constant 1 : index
    %c0_134 = arith.constant 0 : index
    %127 = vector.load %arg12[%c1_132, %c1_133, %c0_134] : memref<2x5x64xbf16, #tpu.memory_space<vmem>>, vector<1x4x64xbf16>
    %128 = vector.shape_cast %127 : vector<1x4x64xbf16> to vector<4x64xbf16>
    %c0_135 = arith.constant 0 : index
    %c0_136 = arith.constant 0 : index
    %c0_137 = arith.constant 0 : index
    %129 = vector.load %arg4[%c0_135, %c0_136, %c0_137] : memref<2x64x128xbf16, #tpu.memory_space<vmem>>, vector<1x64x128xbf16>
    %130 = vector.shape_cast %129 : vector<1x64x128xbf16> to vector<64x128xbf16>
    %cst_138 = arith.constant dense<0.000000e+00> : vector<4x128xf32>
    %131 = tpu.matmul %126, %130, %cst_138 {dimension_numbers = #tpu.dot_dimension_numbers<[1], [0], [0], [1], [0, 0, 1, 1], [], []>} : vector<4x64xbf16>, vector<64x128xbf16>, vector<4x128xf32> -> vector<4x128xf32>
    %c1_139 = arith.constant 1 : index
    %c0_140 = arith.constant 0 : index
    %c0_141 = arith.constant 0 : index
    %132 = vector.load %arg4[%c1_139, %c0_140, %c0_141] : memref<2x64x128xbf16, #tpu.memory_space<vmem>>, vector<1x64x128xbf16>
    %133 = vector.shape_cast %132 : vector<1x64x128xbf16> to vector<64x128xbf16>
    %cst_142 = arith.constant dense<0.000000e+00> : vector<4x128xf32>
    %134 = tpu.matmul %128, %133, %cst_142 {dimension_numbers = #tpu.dot_dimension_numbers<[1], [0], [0], [1], [0, 0, 1, 1], [], []>} : vector<4x64xbf16>, vector<64x128xbf16>, vector<4x128xf32> -> vector<4x128xf32>
    %135 = arith.addf %131, %134 : vector<4x128xf32>
    %c0_143 = arith.constant 0 : index
    %c0_144 = arith.constant 0 : index
    %136 = vector.load %arg8[%c0_143, %c0_144] : memref<1x128xf32, #tpu.memory_space<vmem>>, vector<1x128xf32>
    %137 = vector.broadcast %136 : vector<1x128xf32> to vector<4x128xf32>
    %138 = arith.addf %135, %137 : vector<4x128xf32>
    %cst_145 = arith.constant 0.000000e+00 : f32
    %139 = vector.broadcast %cst_145 : f32 to vector<4x128xf32>
    %140 = arith.maximumf %138, %139 : vector<4x128xf32>
    %141 = arith.truncf %140 : vector<4x128xf32> to vector<4x128xbf16>
    %c1_146 = arith.constant 1 : index
    %c1_147 = arith.constant 1 : index
    %c0_148 = arith.constant 0 : index
    %142 = vector.load %arg13[%c1_146, %c1_147, %c0_148] : memref<2x5x128xbf16, #tpu.memory_space<vmem>>, vector<1x4x128xbf16>
    %143 = vector.shape_cast %142 : vector<1x4x128xbf16> to vector<4x128xbf16>
    %144 = vector.shape_cast %141 : vector<4x128xbf16> to vector<1x4x128xbf16>
    tpu.vector_store %arg13[%c1_146, %c1_147, %c0_148], %144 {strides = array<i32>} : memref<2x5x128xbf16, #tpu.memory_space<vmem>>, vector<1x4x128xbf16>,
    %c1_149 = arith.constant 1 : index
    %c0_150 = arith.constant 0 : index
    %c0_151 = arith.constant 0 : index
    %145 = vector.load %arg13[%c1_149, %c0_150, %c0_151] : memref<2x5x128xbf16, #tpu.memory_space<vmem>>, vector<1x4x128xbf16>
    %146 = vector.shape_cast %145 : vector<1x4x128xbf16> to vector<4x128xbf16>
    %c1_152 = arith.constant 1 : index
    %c1_153 = arith.constant 1 : index
    %c0_154 = arith.constant 0 : index
    %147 = vector.load %arg13[%c1_152, %c1_153, %c0_154] : memref<2x5x128xbf16, #tpu.memory_space<vmem>>, vector<1x4x128xbf16>
    %148 = vector.shape_cast %147 : vector<1x4x128xbf16> to vector<4x128xbf16>
    %c0_155 = arith.constant 0 : index
    %c0_156 = arith.constant 0 : index
    %c0_157 = arith.constant 0 : index
    %149 = vector.load %arg5[%c0_155, %c0_156, %c0_157] : memref<2x128x256xbf16, #tpu.memory_space<vmem>>, vector<1x128x256xbf16>
    %150 = vector.shape_cast %149 : vector<1x128x256xbf16> to vector<128x256xbf16>
    %cst_158 = arith.constant dense<0.000000e+00> : vector<4x256xf32>
    %151 = tpu.matmul %146, %150, %cst_158 {dimension_numbers = #tpu.dot_dimension_numbers<[1], [0], [0], [1], [0, 0, 1, 1], [], []>} : vector<4x128xbf16>, vector<128x256xbf16>, vector<4x256xf32> -> vector<4x256xf32>
    %c1_159 = arith.constant 1 : index
    %c0_160 = arith.constant 0 : index
    %c0_161 = arith.constant 0 : index
    %152 = vector.load %arg5[%c1_159, %c0_160, %c0_161] : memref<2x128x256xbf16, #tpu.memory_space<vmem>>, vector<1x128x256xbf16>
    %153 = vector.shape_cast %152 : vector<1x128x256xbf16> to vector<128x256xbf16>
    %cst_162 = arith.constant dense<0.000000e+00> : vector<4x256xf32>
    %154 = tpu.matmul %148, %153, %cst_162 {dimension_numbers = #tpu.dot_dimension_numbers<[1], [0], [0], [1], [0, 0, 1, 1], [], []>} : vector<4x128xbf16>, vector<128x256xbf16>, vector<4x256xf32> -> vector<4x256xf32>
    %155 = arith.addf %151, %154 : vector<4x256xf32>
    %c0_163 = arith.constant 0 : index
    %c0_164 = arith.constant 0 : index
    %156 = vector.load %arg9[%c0_163, %c0_164] : memref<1x256xf32, #tpu.memory_space<vmem>>, vector<1x256xf32>
    %157 = vector.broadcast %156 : vector<1x256xf32> to vector<4x256xf32>
    %158 = arith.addf %155, %157 : vector<4x256xf32>
    %cst_165 = arith.constant 0.000000e+00 : f32
    %159 = vector.broadcast %cst_165 : f32 to vector<4x256xf32>
    %160 = arith.maximumf %158, %159 : vector<4x256xf32>
    %c1_166 = arith.constant 1 : index
    %c0_167 = arith.constant 0 : index
    %c0_168 = arith.constant 0 : index
    %161 = vector.load %arg10[%c1_166, %c0_167, %c0_168] : memref<2x4x256xf32, #tpu.memory_space<vmem>>, vector<1x4x256xf32>
    %162 = vector.shape_cast %161 : vector<1x4x256xf32> to vector<4x256xf32>
    %163 = vector.shape_cast %160 : vector<4x256xf32> to vector<1x4x256xf32>
    tpu.vector_store %arg10[%c1_166, %c0_167, %c0_168], %163 {strides = array<i32>} : memref<2x4x256xf32, #tpu.memory_space<vmem>>, vector<1x4x256xf32>,
    return
  }
  func.func @transform_0(%arg0: i32) -> (i32, i32, i32) {
    %c0_i32 = arith.constant 0 : i32
    %c0_i32_0 = arith.constant 0 : i32
    %c0_i32_1 = arith.constant 0 : i32
    return %arg0, %c0_i32, %c0_i32_0 : i32, i32, i32
  }
  func.func @transform_1(%arg0: i32) -> (i32, i32, i32) {
    %c0_i32 = arith.constant 0 : i32
    %c0_i32_0 = arith.constant 0 : i32
    %c0_i32_1 = arith.constant 0 : i32
    %c0_i32_2 = arith.constant 0 : i32
    return %c0_i32, %c0_i32_0, %c0_i32_1 : i32, i32, i32
  }
  func.func @transform_2(%arg0: i32) -> (i32, i32, i32) {
    %c0_i32 = arith.constant 0 : i32
    %c0_i32_0 = arith.constant 0 : i32
    %c0_i32_1 = arith.constant 0 : i32
    %c0_i32_2 = arith.constant 0 : i32
    return %c0_i32, %c0_i32_0, %c0_i32_1 : i32, i32, i32
  }
  func.func @transform_3(%arg0: i32) -> (i32, i32, i32) {
    %c0_i32 = arith.constant 0 : i32
    %c0_i32_0 = arith.constant 0 : i32
    %c0_i32_1 = arith.constant 0 : i32
    %c0_i32_2 = arith.constant 0 : i32
    return %c0_i32, %c0_i32_0, %c0_i32_1 : i32, i32, i32
  }
  func.func @transform_4(%arg0: i32) -> (i32, i32, i32) {
    %c0_i32 = arith.constant 0 : i32
    %c0_i32_0 = arith.constant 0 : i32
    %c0_i32_1 = arith.constant 0 : i32
    %c0_i32_2 = arith.constant 0 : i32
    return %c0_i32, %c0_i32_0, %c0_i32_1 : i32, i32, i32
  }
  func.func @transform_5(%arg0: i32) -> (i32, i32) {
    %c0_i32 = arith.constant 0 : i32
    %c0_i32_0 = arith.constant 0 : i32
    %c0_i32_1 = arith.constant 0 : i32
    return %c0_i32, %c0_i32_0 : i32, i32
  }
  func.func @transform_6(%arg0: i32) -> (i32, i32) {
    %c0_i32 = arith.constant 0 : i32
    %c0_i32_0 = arith.constant 0 : i32
    %c0_i32_1 = arith.constant 0 : i32
    return %c0_i32, %c0_i32_0 : i32, i32
  }
  func.func @transform_7(%arg0: i32) -> (i32, i32) {
    %c0_i32 = arith.constant 0 : i32
    %c0_i32_0 = arith.constant 0 : i32
    %c0_i32_1 = arith.constant 0 : i32
    return %c0_i32, %c0_i32_0 : i32, i32
  }
  func.func @transform_8(%arg0: i32) -> (i32, i32) {
    %c0_i32 = arith.constant 0 : i32
    %c0_i32_0 = arith.constant 0 : i32
    %c0_i32_1 = arith.constant 0 : i32
    return %c0_i32, %c0_i32_0 : i32, i32
  }
  func.func @transform_9(%arg0: i32) -> (i32, i32, i32) {
    %c0_i32 = arith.constant 0 : i32
    %c0_i32_0 = arith.constant 0 : i32
    %c0_i32_1 = arith.constant 0 : i32
    return %arg0, %c0_i32, %c0_i32_0 : i32, i32, i32
  }
}

</mosaic_0001>

<bundles_post_ra>
// kernel: apply.1
= control target key start
LH: loop header
LB: loop body
LE: loop exit
PB: predicated region body
PF: predicated region fallthrough
CT: control target
= control target key end

     0   :  { %v3109_v39 = vmov 0.0   ;;  %vm33_vm0 = vcmask 1042432   ;;  %vm34_vm1 = vsmask.f32 2304  ;;  %v36_v53 = vld [vmem:[#allocation2] sm:$0x7]  ;;  %s3893_s1 = inlined_call_operand.vmem [shape: bf16[2,256,128], index: 1, kind: input, shape index: {}]   ;;  %s3894_s0 = inlined_call_operand.vmem [shape: bf16[2,5,256], index: 0, kind: input, shape index: {}]   ;;  %s3895_s2 = inlined_call_operand.vmem [shape: bf16[2,128,64], index: 2, kind: input, shape index: {}]   ;;  %s3896_s5 = inlined_call_operand.vmem [shape: f32[1,128], index: 5, kind: input, shape index: {}]   ;;  %s3897_s3 = inlined_call_operand.vmem [shape: bf16[2,64,128], index: 3, kind: input, shape index: {}]   ;;  %s3898_s6 = inlined_call_operand.vmem [shape: f32[1,64], index: 6, kind: input, shape index: {}]   ;;  %s3899_s4 = inlined_call_operand.vmem [shape: bf16[2,128,256], index: 4, kind: input, shape index: {}]   ;;  %s3900_s7 = inlined_call_operand.vmem [shape: f32[1,128], index: 7, kind: input, shape index: {}]   ;;  %s3901_s8 = inlined_call_operand.vmem [shape: f32[1,256], index: 8, kind: input, shape index: {}]   ;;  %s3902_s9 = inlined_call_operand.vmem [shape: f32[2,4,256], index: 9, kind: output, shape index: {}]  }
   0x1   :  { %v2935_v0 = vld [vmem:[%s3893_s1 + $0xc0] sm:$0xff]   ;;  %v2939_v4 = vld [vmem:[%s3893_s1 + $0xc8] sm:$0xff]   ;;  %v2943_v8 = vld [vmem:[%s3893_s1 + $0xd0] sm:$0xff]   ;;  %vm3110_vm3 = vmmov 0   ;;  %vm42_vm4 = vcmask 518144   ;;  %vm735_vm8 = vcmask 523264  }
   0x2   :  { %v2936_v1 = vld [vmem:[%s3893_s1 + $0x40] sm:$0xff]   ;;  %2660 = vmatprep.subr.bf16.mxu0 %v2935_v0  ;;  %v2940_v5 = vld [vmem:[%s3893_s1 + $0x48] sm:$0xff]   ;;  %v2944_v9 = vld [vmem:[%s3893_s1 + $0x50] sm:$0xff]   ;;  %vm677_vm6 = vsmask.f32 2306 }
   0x3   :  { %v2937_v2 = vld [vmem:[%s3893_s1 + $0x80] sm:$0xff]   ;;  %2682 = vmatprep.subr.bf16.mxu1 %v2936_v1  ;;  %v2941_v6 = vld [vmem:[%s3893_s1 + $0x88] sm:$0xff]   ;;  %v2945_v10 = vld [vmem:[%s3893_s1 + $0x90] sm:$0xff]  }
   0x4   :  { %v2938_v3 = vld [vmem:[%s3893_s1] sm:$0xff]   ;;  %2661 = vmatpush3.bf16.msra.mxu0 %v2937_v2  ;;  %v2942_v7 = vld [vmem:[%s3893_s1 + $0x8] sm:$0xff]   ;;  %v2946_v11 = vld [vmem:[%s3893_s1 + $0x10] sm:$0xff]  }
   0x5   :  { %2683 = vmatpush3.bf16.msra.mxu1 %v2938_v3  ;;  %2662 = vmatprep.subr.bf16.mxu0 %v2939_v4  ;;  %v2947_v12 = vld [vmem:[%s3893_s1 + $0xd8] sm:$0xff]   ;;  %v2951_v16 = vld [vmem:[%s3893_s1 + $0xe0] sm:$0xff]   ;;  %v2955_v20 = vld [vmem:[%s3893_s1 + $0xe8] sm:$0xff]  }
   0x6   :  { %2684 = vmatprep.subr.bf16.mxu1 %v2940_v5  ;;  %v2948_v13 = vld [vmem:[%s3893_s1 + $0x58] sm:$0xff]   ;;  %v2952_v17 = vld [vmem:[%s3893_s1 + $0x60] sm:$0xff]   ;;  %v2956_v21 = vld [vmem:[%s3893_s1 + $0x68] sm:$0xff]  }
   0x7   :  { %v2949_v14 = vld [vmem:[%s3893_s1 + $0x98] sm:$0xff]   ;;  %v2953_v18 = vld [vmem:[%s3893_s1 + $0xa0] sm:$0xff]   ;;  %v2957_v22 = vld [vmem:[%s3893_s1 + $0xa8] sm:$0xff]  }
   0x8   :  { %2663 = vmatpush3.bf16.msra.mxu0 %v2941_v6  ;;  %v2950_v15 = vld [vmem:[%s3893_s1 + $0x18] sm:$0xff]   ;;  %v2954_v19 = vld [vmem:[%s3893_s1 + $0x20] sm:$0xff]   ;;  %v2958_v23 = vld [vmem:[%s3893_s1 + $0x28] sm:$0xff]  }
   0x9   :  { %2685 = vmatpush3.bf16.msra.mxu1 %v2942_v7  ;;  %2664 = vmatprep.subr.bf16.mxu0 %v2943_v8  ;;  %v2959_v24 = vld [vmem:[%s3893_s1 + $0xf0] sm:$0xff]   ;;  %v2963_v28 = vld [vmem:[%s3893_s1 + $0xf8] sm:$0xff]   ;;  %v57_v32 = vld [vmem:[%s3894_s0] sm:$0x77] }
   0xa   :  { %2686 = vmatprep.subr.bf16.mxu1 %v2944_v9  ;;  %v2960_v25 = vld [vmem:[%s3893_s1 + $0x70] sm:$0xff]   ;;  %v2964_v29 = vld [vmem:[%s3893_s1 + $0x78] sm:$0xff]   ;;  %v56_v33 = vld [vmem:[%s3894_s0] sm:$0x33]  ;;  %v2337_v34 = vcombine.low %v57_v32, %v57_v32  ;;  %v2338_v35 = vcombine.high %v57_v32, %v57_v32 }
   0xb   :  { %v2961_v26 = vld [vmem:[%s3893_s1 + $0xb0] sm:$0xff]   ;;  %v2965_v30 = vld [vmem:[%s3893_s1 + $0xb8] sm:$0xff]   ;;  %v2355_v36 = vcombine.low %v56_v33, %v56_v33  ;;  %v2356_v37 = vcombine.high %v56_v33, %v56_v33  ;;  %v2971_v38 = vld [vmem:[%s3895_s2] sm:$0xff]  }
   0xc   :  { %2665 = vmatpush3.bf16.msra.mxu0 %v2945_v10  ;;  %v2962_v27 = vld [vmem:[%s3893_s1 + $0x30] sm:$0xff]   ;;  %v2966_v31 = vld [vmem:[%s3893_s1 + $0x38] sm:$0xff]   ;;  %v136_v40 = vshrl.u32 %v2338_v35, 16  ;;  %v138_v41 = vshll.u32 %v2338_v35, 16  ;;  %v129_v42 = vshrl.u32 %v2337_v34, 16  ;;  %v131_v43 = vshll.u32 %v2337_v34, 16  ;;  %vm3295_vm2 = vmand %vm33_vm0, %vm34_vm1 }
   0xd   :  { %2687 = vmatpush3.bf16.msra.mxu1 %v2946_v11  ;;  %2666 = vmatprep.subr.bf16.mxu0 %v2947_v12  ;;  %v2972_v46 = vld [vmem:[%s3895_s2 + $0x8] sm:$0xff]   ;;  %v2973_v47 = vld [vmem:[%s3895_s2 + $0x40] sm:$0xff]   ;;  %v2974_v50 = vld [vmem:[%s3895_s2 + $0x10] sm:$0xff]   ;;  %v37_v57 = vsel %vm3295_vm2, 0, %v36_v53 }
   0xe   :  { %2688 = vmatprep.subr.bf16.mxu1 %v2948_v13  ;;  %415 = vmatprep.mubr.bf16.mxu1 %v2356_v37  ;;  %v140_v44 = vrot.slane %v138_v41, 1  ;;  %v133_v45 = vrot.slane %v131_v43, 1  ;;  %v2975_v51 = vld [vmem:[%s3895_s2 + $0x48] sm:$0xff]   ;;  %v2976_v52 = vld [vmem:[%s3895_s2 + $0x18] sm:$0xff]   ;;  %v2977_v54 = vld [vmem:[%s3895_s2 + $0x50] sm:$0xff]  }
   0xf   :  { %v2978_v56 = vld [vmem:[%s3895_s2 + $0x20] sm:$0xff]   ;;  %38 = vst [vmem:[#allocation2] sm:$0x7] %v37_v57  ;;  %v2979_v58 = vld [vmem:[%s3895_s2 + $0x58] sm:$0xff]   ;;  %v2980_v59 = vld [vmem:[%s3895_s2 + $0x28] sm:$0xff]  }
  0x10   :  { %2667 = vmatpush3.bf16.msra.mxu0 %v2949_v14  ;;  %v141_v48 = vor.u32 %v140_v44, %v136_v40  ;;  %v134_v49 = vor.u32 %v133_v45, %v129_v42  ;;  %v2981_v60 = vld [vmem:[%s3895_s2 + $0x60] sm:$0xff]   ;;  %v2982_v61 = vld [vmem:[%s3895_s2 + $0x30] sm:$0xff]   ;;  %v2983_v62 = vld [vmem:[%s3895_s2 + $0x68] sm:$0xff]  }
  0x11   :  { %2689 = vmatpush3.bf16.msra.mxu1 %v2950_v15  ;;  %2668 = vmatprep.subr.bf16.mxu0 %v2951_v16  ;;  %v2984_v63 = vld [vmem:[%s3895_s2 + $0x38] sm:$0xff]   ;;  %v2985_v0 = vld [vmem:[%s3895_s2 + $0x70] sm:$0xff]   ;;  %v3345_v11 = vld [vmem:[%s3896_s5] ss:$0 sm:$0xff] }
  0x12   :  { %2690 = vmatprep.subr.bf16.mxu1 %v2952_v17  ;;  %272 = vmatprep.mubr.bf16.mxu0 %v141_v48  ;;  %v2986_v1 = vld [vmem:[%s3895_s2 + $0x78] sm:$0xff]   ;;  %vm43_vm5 = vmand %vm42_vm4, %vm34_vm1  ;;  %v2994_v33 = vld [vmem:[%s3897_s3 + $0x30] sm:$0xff]  }
  0x13   :  { %v2993_v32 = vld [vmem:[%s3897_s3 + $0x18] sm:$0xff]   ;;  %v3387_v41 = vld [vmem:[%s3898_s6] ss:$0 sm:$0xff]  ;;  %vm3392_vm7 = vmand %vm42_vm4, %vm677_vm6 }
  0x14   :  { %2669 = vmatpush3.bf16.msra.mxu0 %v2953_v18  ;;  %v2995_v34 = vld [vmem:[%s3897_s3 + $0x38] sm:$0xff]   ;;  %vm3610_vm9 = vmand %vm33_vm0, %vm677_vm6 }
  0x15   :  { %2691 = vmatpush3.bf16.msra.mxu1 %v2954_v19  ;;  %2670 = vmatprep.subr.bf16.mxu0 %v2955_v20 }
  0x16   :  { %2692 = vmatprep.subr.bf16.mxu1 %v2956_v21 }
  0x18   :  { %2671 = vmatpush3.bf16.msra.mxu0 %v2957_v22 }
  0x19   :  { %2693 = vmatpush3.bf16.msra.mxu1 %v2958_v23  ;;  %2672 = vmatprep.subr.bf16.mxu0 %v2959_v24  ;;  %v44_v23 = vld [vmem:[#allocation3] sm:$0x7]  ;;  %v47_v24 = vld [vmem:[#allocation3 + $0x4] sm:$0x7] }
  0x1a   :  { %2694 = vmatprep.subr.bf16.mxu1 %v2960_v25  ;;  %v45_v25 = vsel %vm43_vm5, 0, %v44_v23  ;;  %v3530_v23 = vld [vmem:[%s3899_s4 + $0xc0] ss:$8 sps:$4 sm:$0xff]  }
  0x1b   :  { %46 = vst [vmem:[#allocation3] sm:$0x7] %v45_v25  ;;  %v3542_v25 = vld [vmem:[%s3899_s4 + $0x60] ss:$8 sps:$4 sm:$0xff]  }
  0x1c   :  { %2673 = vmatpush3.bf16.msra.mxu0 %v2961_v26  ;;  %v48_v26 = vsel %vm43_vm5, 0, %v47_v24  ;;  %v3536_v24 = vld [vmem:[%s3899_s4 + $0x64] ss:$8 sps:$4 sm:$0xff]  }
  0x1d   :  { %2695 = vmatpush3.bf16.msra.mxu1 %v2962_v27  ;;  %2674 = vmatprep.subr.bf16.mxu0 %v2963_v28  ;;  %49 = vst [vmem:[#allocation3 + $0x4] sm:$0x7] %v48_v26  ;;  %v2988_v27 = vld [vmem:[%s3897_s3] sm:$0xff]   ;;  %v2989_v28 = vld [vmem:[%s3897_s3 + $0x8] sm:$0xff]   ;;  %v3548_v26 = vld [vmem:[%s3899_s4 + $0xd0] ss:$8 sps:$4 sm:$0xff]  }
  0x1e   :  { %2696 = vmatprep.subr.bf16.mxu1 %v2964_v29  ;;  %v2990_v29 = vld [vmem:[%s3897_s3 + $0x20] sm:$0xff]  }
  0x20   :  { %2675 = vmatpush3.bf16.msra.mxu0 %v2965_v30  ;;  %v2991_v30 = vld [vmem:[%s3897_s3 + $0x10] sm:$0xff]  }
  0x21   :  { %2697 = vmatpush3.bf16.msra.mxu1 %v2966_v31  ;;  %2804 = vmatprep.subr.bf16.mxu0 %v3109_v39  ;;  %v2992_v31 = vld [vmem:[%s3897_s3 + $0x28] sm:$0xff]  }
  0x22   :  { %2824 = vmatprep.subr.bf16.mxu1 %v3109_v39  ;;  %v679_v53 = vld [vmem:[#allocation3] sm:$0x7] }
  0x23   :  { %273 = vmatmul.mubr.bf16.vlgmr.msra.gmra.mrb[0].mxu0 %v134_v49 }
  0x24   :  { %416 = vmatmul.mubr.bf16.vlgmr.msra.gmra.mrb[0].mxu1 %v2355_v36  ;;  %2805 = vmatpush3.bf16.msra.mxu0 %v2973_v47 }
  0x25   :  { %2825 = vmatpush3.bf16.msra.mxu1 %v2971_v38  ;;  %2806 = vmatprep.subr.bf16.mxu0 %v3109_v39 }
  0x26   :  { %2826 = vmatprep.subr.bf16.mxu1 %v3109_v39  ;;  %2840 = vmatprep.mubr.msk.bf16.mxu1 %vm3110_vm3, %v3109_v39 }
  0x27   :  { %2820 = vmatprep.mubr.msk.bf16.mxu0 %vm3110_vm3, %v3109_v39 }
  0x28   :  { %2807 = vmatpush3.bf16.msra.mxu0 %v2975_v51 }
  0x29   :  { %2827 = vmatpush3.bf16.msra.mxu1 %v2972_v46  ;;  %2808 = vmatprep.subr.bf16.mxu0 %v3109_v39 }
  0x2a   :  { %2828 = vmatprep.subr.bf16.mxu1 %v3109_v39 }
  0x2c   :  { %2809 = vmatpush3.bf16.msra.mxu0 %v2977_v54 }
  0x2d   :  { %2829 = vmatpush3.bf16.msra.mxu1 %v2974_v50  ;;  %2810 = vmatprep.subr.bf16.mxu0 %v3109_v39 }
  0x2e   :  { %2830 = vmatprep.subr.bf16.mxu1 %v3109_v39 }
  0x30   :  { %2811 = vmatpush3.bf16.msra.mxu0 %v2979_v58 }
  0x31   :  { %2831 = vmatpush3.bf16.msra.mxu1 %v2976_v52  ;;  %2812 = vmatprep.subr.bf16.mxu0 %v3109_v39  ;;  %v53_v52 = vld [vmem:[#allocation4 + $0x4] sm:$0x7] }
  0x32   :  { %2832 = vmatprep.subr.bf16.mxu1 %v3109_v39 }
  0x34   :  { %2813 = vmatpush3.bf16.msra.mxu0 %v2981_v60 }
  0x35   :  { %2833 = vmatpush3.bf16.msra.mxu1 %v2978_v56  ;;  %2814 = vmatprep.subr.bf16.mxu0 %v3109_v39 }
  0x36   :  { %2834 = vmatprep.subr.bf16.mxu1 %v3109_v39 }
  0x38   :  { %2815 = vmatpush3.bf16.msra.mxu0 %v2983_v62 }
  0x39   :  { %2835 = vmatpush3.bf16.msra.mxu1 %v2980_v59  ;;  %2816 = vmatprep.subr.bf16.mxu0 %v3109_v39 }
  0x3a   :  { %2836 = vmatprep.subr.bf16.mxu1 %v3109_v39 }
  0x3c   :  { %2817 = vmatpush3.bf16.msra.mxu0 %v2985_v0  ;;  %v3408_v0 = vld [vmem:[%s3899_s4] ss:$8 sps:$4 sm:$0xff]  }
  0x3d   :  { %2837 = vmatpush3.bf16.msra.mxu1 %v2982_v61  ;;  %2818 = vmatprep.subr.bf16.mxu0 %v3109_v39 }
  0x3e   :  { %2838 = vmatprep.subr.bf16.mxu1 %v3109_v39 }
  0x40   :  { %2819 = vmatpush3.bf16.msra.mxu0 %v2986_v1  ;;  %v3415_v1 = vld [vmem:[%s3899_s4 + $0x14] ss:$8 sps:$4 sm:$0xff]  }
  0x41   :  { %2839 = vmatpush3.bf16.msra.mxu1 %v2984_v63  ;;  %2844 = vmatprep.subr.bf16.mxu0 %v3109_v39  ;;  %v3403_v63 = vld [vmem:[%s3899_s4 + $0x4] ss:$8 sps:$4 sm:$0xff]  }
  0x42   :  { %2856 = vmatprep.subr.bf16.mxu1 %v3109_v39 }
  0xf6   :  { %v2676_v7 = vpop.f32.mrb[0].mxu0 }
  0xf7   :  { %v2698_v2 = vpop.f32.mrb[0].mxu1  ;;  %v2677_v8 = vpop.f32.mrb[1].mxu0 }
  0xf8   :  { %v2699_v3 = vpop.f32.mrb[1].mxu1  ;;  %v2678_v9 = vadd.f32 %v2677_v8, %v2676_v7  ;;  %v2679_v10 = vpop.f32.mrb[2].mxu0  ;;  %v3441_v7 = vld [vmem:[%s3899_s4 + $0x24] ss:$8 sps:$4 sm:$0xff]   ;;  %v3446_v8 = vld [vmem:[%s3899_s4 + $0x20] ss:$8 sps:$4 sm:$0xff]  }
  0xf9   :  { %v2700_v4 = vadd.f32 %v2699_v3, %v2698_v2  ;;  %v2701_v5 = vpop.f32.mrb[2].mxu1  ;;  %v2680_v12 = vpop.f32.mrb[3].mxu0  ;;  %v3420_v2 = vld [vmem:[%s3899_s4 + $0x10] ss:$8 sps:$4 sm:$0xff]   ;;  %v3425_v3 = vld [vmem:[%s3899_s4 + $0x80] ss:$8 sps:$4 sm:$0xff]  }
  0xfa   :  { %v2702_v6 = vpop.f32.mrb[3].mxu1  ;;  %v50_v5 = vld [vmem:[#allocation4] sm:$0x7]  ;;  %v3464_v12 = vld [vmem:[%s3899_s4 + $0x34] ss:$8 sps:$4 sm:$0xff]  }
  0xfb   :  { %v418_v13 = vadd.f32 %v2700_v4, %v2678_v9  ;;  %v3430_v4 = vld [vmem:[%s3899_s4 + $0x84] ss:$8 sps:$4 sm:$0xff]   ;;  %v51_v6 = vsel %vm3295_vm2, 0, %v50_v5  ;;  %v3452_v9 = vld [vmem:[%s3899_s4 + $0x94] ss:$8 sps:$4 sm:$0xff]  }
  0xfc   :  { %52 = vst [vmem:[#allocation4] sm:$0x7] %v51_v6  ;;  %v3458_v10 = vld [vmem:[%s3899_s4 + $0x90] ss:$8 sps:$4 sm:$0xff]   ;;  %v3046_v6 = vld [vmem:[%s3893_s1] sm:$0xff]  }
  0xfd   :  { %v430_v14 = vadd.f32 %v3345_v11, %v418_v13  ;;  %v3470_v13 = vld [vmem:[%s3899_s4 + $0x30] ss:$8 sps:$4 sm:$0xff]  }
  0xff   :  { %v431_v15 = vmax.f32 %v430_v14, 0.0  ;;  %v3476_v14 = vld [vmem:[%s3899_s4 + $0xa4] ss:$8 sps:$4 sm:$0xff]  }
 0x101   :  { %v432_v16 = vpack.c.bf16 %v431_v15, %v431_v15  ;;  %v3482_v15 = vld [vmem:[%s3899_s4 + $0xa0] ss:$8 sps:$4 sm:$0xff]  }
 0x103   :  { %433 = vst [vmem:[#allocation2] sm:$0x3] %v432_v16  ;;  %v3488_v16 = vld [vmem:[%s3899_s4 + $0x44] ss:$8 sps:$4 sm:$0xff]  }
 0x10a   :  { %v434_v17 = vld [vmem:[#allocation2] sm:$0x3] }
 0x10b   :  { %2841 = vmatmul.mubr.bf16.vlgmr.msra.gmra.mrb[4].mxu1 %v434_v17  ;;  %v2987_v18 = vld [vmem:[#allocation2] ss:$0 sps:$4 sm:$0x77]  }
 0x10c   :  { %2864 = vmatprep.mubr.msk.bf16.mxu1 %vm3110_vm3, %v3109_v39  ;;  %v475_v19 = vshll.u32 %v2987_v18, 16  ;;  %v473_v20 = vshrl.u32 %v2987_v18, 16  ;;  %2857 = vmatpush3.bf16.msra.mxu1 %v2988_v27  ;;  %v3494_v17 = vld [vmem:[%s3899_s4 + $0x40] ss:$8 sps:$4 sm:$0xff]   ;;  %v3500_v18 = vld [vmem:[%s3899_s4 + $0xb4] ss:$8 sps:$4 sm:$0xff]  }
 0x10d   :  { %2858 = vmatprep.subr.bf16.mxu1 %v3109_v39  ;;  %v3553_v27 = vld [vmem:[%s3899_s4 + $0xd4] ss:$8 sps:$4 sm:$0xff]  }
 0x10e   :  { %v477_v21 = vrot.slane %v475_v19, 1  ;;  %v3506_v19 = vld [vmem:[%s3899_s4 + $0xb0] ss:$8 sps:$4 sm:$0xff]  }
 0x110   :  { %v478_v22 = vor.u32 %v477_v21, %v473_v20  ;;  %2859 = vmatpush3.bf16.msra.mxu1 %v2989_v28  ;;  %v3512_v20 = vld [vmem:[%s3899_s4 + $0x54] ss:$8 sps:$4 sm:$0xff]   ;;  %v3518_v21 = vld [vmem:[%s3899_s4 + $0x50] ss:$8 sps:$4 sm:$0xff]  }
 0x111   :  { %2860 = vmatprep.subr.bf16.mxu1 %v3109_v39  ;;  %v3559_v28 = vld [vmem:[%s3899_s4 + $0x70] ss:$8 sps:$4 sm:$0xff]  }
 0x112   :  { %2821 = vmatmul.mubr.bf16.vlgmr.msra.gmra.mrb[4].mxu0 %v478_v22  ;;  %v3524_v22 = vld [vmem:[%s3899_s4 + $0xc4] ss:$8 sps:$4 sm:$0xff]  }
 0x113   :  { %2852 = vmatprep.mubr.msk.bf16.mxu0 %vm3110_vm3, %v3109_v39  ;;  %2845 = vmatpush3.bf16.msra.mxu0 %v2990_v29  ;;  %v3564_v29 = vld [vmem:[%s3899_s4 + $0x74] ss:$8 sps:$4 sm:$0xff]  }
 0x114   :  { %2861 = vmatpush3.bf16.msra.mxu1 %v2991_v30  ;;  %2846 = vmatprep.subr.bf16.mxu0 %v3109_v39  ;;  %v3569_v30 = vld [vmem:[%s3899_s4 + $0xe4] ss:$8 sps:$4 sm:$0xff]  }
 0x115   :  { %2862 = vmatprep.subr.bf16.mxu1 %v3109_v39 }
 0x117   :  { %2847 = vmatpush3.bf16.msra.mxu0 %v2992_v31  ;;  %v3577_v31 = vld [vmem:[%s3899_s4 + $0xe0] ss:$8 sps:$4 sm:$0xff]  }
 0x118   :  { %2863 = vmatpush3.bf16.msra.mxu1 %v2993_v32  ;;  %2848 = vmatprep.subr.bf16.mxu0 %v3109_v39  ;;  %v3111_v32 = vmov 0  }
 0x119   :  { %1118 = vmatprep.subr.bf16.mxu1 %v3403_v63 }
 0x11b   :  { %2849 = vmatpush3.bf16.msra.mxu0 %v2994_v33  ;;  %v3587_v33 = vld [vmem:[%s3899_s4 + $0xf0] ss:$8 sps:$4 sm:$0xff]  }
 0x11c   :  { %2850 = vmatprep.subr.bf16.mxu0 %v3109_v39 }
 0x11f   :  { %2851 = vmatpush3.bf16.msra.mxu0 %v2995_v34  ;;  %v3592_v34 = vld [vmem:[%s3899_s4 + $0xf4] ss:$8 sps:$4 sm:$0xff]  }
 0x120   :  { %997 = vmatprep.subr.bf16.mxu0 %v3430_v4 }
 0x1de   :  { %v650_v35 = vpop.f32.mrb[4].mxu1 }
 0x1df   :  { %v2842_v36 = vpop.f32.mrb[5].mxu1 }
 0x1e0   :  { %v653_v37 = vpop.f32.mrb[6].mxu1  ;;  %v3047_v36 = vld [vmem:[%s3893_s1 + $0xc0] sm:$0xff]  }
 0x1e1   :  { %v2843_v38 = vpop.f32.mrb[7].mxu1 }
 0x1e5   :  { %v562_v40 = vpop.f32.mrb[4].mxu0 }
 0x1e6   :  { %v651_v42 = vadd.f32 %v650_v35, %v562_v40  ;;  %v2822_v43 = vpop.f32.mrb[5].mxu0  ;;  %v3045_v35 = vld [vmem:[%s3893_s1 + $0x40] sm:$0xff]  }
 0x1e7   :  { %v565_v44 = vpop.f32.mrb[6].mxu0 }
 0x1e8   :  { %v663_v45 = vadd.f32 %v3387_v41, %v651_v42  ;;  %v2823_v46 = vpop.f32.mrb[7].mxu0  ;;  %v3605_v44 = vld [vmem:[%s3900_s7] ss:$0 sm:$0xff] }
 0x1ea   :  { %v664_v47 = vmax.f32 %v663_v45, 0.0 }
 0x1ec   :  { %v2656_v48 = vpack.c.bf16 %v664_v47, %v664_v47 }
 0x1ee   :  { %v670_v49 = vshrl.u32 %v2656_v48, 16  ;;  %v673_v51 = vshll.u32 %v2656_v48, 16 }
 0x1f0   :  { %v672_v50 = vrot.slane %v670_v49, 7 }
 0x1f2   :  { %v675_v54 = vor.u32 %v673_v51, %v672_v50 }
 0x1f4   :  { %v680_v56 = vsel %vm3392_vm7, %v675_v54, %v679_v53 }
 0x1f5   :  { %681 = vst [vmem:[#allocation3] sm:$0x7] %v680_v56 }
 0x1fc   :  { %v682_v57 = vld [vmem:[#allocation3] sm:$0x3] }
 0x1fd   :  { %2865 = vmatmul.mubr.msk.bf16.vlgmr.msra.gmra.mrb[8].mxu1 %vm735_vm8, %v682_v57  ;;  %v2996_v58 = vld [vmem:[#allocation3] ss:$0 sps:$4 sm:$0x77]  }
 0x1fe   :  { %v707_v59 = vshll.u32 %v2996_v58, 16  ;;  %v705_v60 = vshrl.u32 %v2996_v58, 16  ;;  %1119 = vmatpush1.bf16.msra.mxu1 %v3408_v0  ;;  %1150 = vmatprep.mubr.bf16.mxu1 %v3111_v32  ;;  %v868_v58 = vld [vmem:[#allocation4] sm:$0x7] }
 0x1ff   :  { %1120 = vmatprep.subr.bf16.mxu1 %v3415_v1 }
 0x200   :  { %v709_v61 = vrot.slane %v707_v59, 1 }
 0x202   :  { %v710_v62 = vor.u32 %v709_v61, %v705_v60  ;;  %1121 = vmatpush1.bf16.msra.mxu1 %v3420_v2  ;;  %v2480_v61 = vld [vmem:[%s3894_s0 + $0x8] sm:$0x77] }
 0x203   :  { %1122 = vmatprep.subr.bf16.mxu1 %v3441_v7  ;;  %v2514_v5 = vcombine.high %v2480_v61, %v2480_v61 }
 0x204   :  { %2853 = vmatmul.mubr.msk.bf16.vlgmr.msra.gmra.mrb[8].mxu0 %vm735_vm8, %v710_v62  ;;  %v3622_v62 = vld [vmem:[%s3894_s0 + $0x8] sm:$0x33] }
 0x205   :  { %998 = vmatpush1.bf16.msra.mxu0 %v3425_v3  ;;  %1029 = vmatprep.mubr.bf16.mxu0 %v3111_v32 }
 0x206   :  { %1123 = vmatpush1.bf16.msra.mxu1 %v3446_v8  ;;  %999 = vmatprep.subr.bf16.mxu0 %v3452_v9 }
 0x207   :  { %1124 = vmatprep.subr.bf16.mxu1 %v3464_v12 }
 0x209   :  { %1000 = vmatpush1.bf16.msra.mxu0 %v3458_v10 }
 0x20a   :  { %1125 = vmatpush1.bf16.msra.mxu1 %v3470_v13  ;;  %1001 = vmatprep.subr.bf16.mxu0 %v3476_v14 }
 0x20b   :  { %1126 = vmatprep.subr.bf16.mxu1 %v3488_v16 }
 0x20d   :  { %1002 = vmatpush1.bf16.msra.mxu0 %v3482_v15 }
 0x20e   :  { %1127 = vmatpush1.bf16.msra.mxu1 %v3494_v17  ;;  %1003 = vmatprep.subr.bf16.mxu0 %v3500_v18 }
 0x20f   :  { %1128 = vmatprep.subr.bf16.mxu1 %v3512_v20 }
 0x211   :  { %1004 = vmatpush1.bf16.msra.mxu0 %v3506_v19 }
 0x212   :  { %1129 = vmatpush1.bf16.msra.mxu1 %v3518_v21  ;;  %1005 = vmatprep.subr.bf16.mxu0 %v3524_v22 }
 0x213   :  { %1130 = vmatprep.subr.bf16.mxu1 %v3536_v24 }
 0x215   :  { %1006 = vmatpush1.bf16.msra.mxu0 %v3530_v23 }
 0x216   :  { %1131 = vmatpush1.bf16.msra.mxu1 %v3542_v25  ;;  %1007 = vmatprep.subr.bf16.mxu0 %v3553_v27 }
 0x217   :  { %1132 = vmatprep.subr.bf16.mxu1 %v3564_v29 }
 0x219   :  { %1008 = vmatpush1.bf16.msra.mxu0 %v3548_v26 }
 0x21a   :  { %1009 = vmatprep.subr.bf16.mxu0 %v3569_v30  ;;  %1133 = vmatpush1.bf16.msra.mxu1 %v3559_v28 }
 0x21b   :  { %2754 = vmatprep.subr.bf16.mxu1 %v3045_v35  ;;  %v2532_v35 = vcombine.high %v3622_v62, %v3622_v62 }
 0x21d   :  { %1010 = vmatpush1.bf16.msra.mxu0 %v3577_v31 }
 0x21e   :  { %1011 = vmatprep.subr.bf16.mxu0 %v3592_v34 }
 0x221   :  { %1012 = vmatpush1.bf16.msra.mxu0 %v3587_v33 }
 0x222   :  { %2732 = vmatprep.subr.bf16.mxu0 %v3047_v36  ;;  %v3050_v36 = vld [vmem:[%s3893_s1 + $0x48] sm:$0xff]  }
 0x2d0   :  { %v840_v37 = vpop.f32.mrb[8].mxu1 }
 0x2d1   :  { %v2866_v38 = vpop.f32.mrb[9].mxu1 }
 0x2d2   :  { %v843_v40 = vpop.f32.mrb[10].mxu1  ;;  %v1262_v38 = vshll.u32 %v2514_v5, 16 }
 0x2d3   :  { %v2867_v42 = vpop.f32.mrb[11].mxu1 }
 0x2d4   :  { %v3051_v42 = vld [vmem:[%s3893_s1 + $0x8] sm:$0xff]  }
 0x2d7   :  { %v773_v43 = vpop.f32.mrb[8].mxu0 }
 0x2d8   :  { %v841_v45 = vadd.f32 %v840_v37, %v773_v43  ;;  %v2854_v46 = vpop.f32.mrb[9].mxu0 }
 0x2d9   :  { %v776_v47 = vpop.f32.mrb[10].mxu0  ;;  %v1260_v46 = vshrl.u32 %v2514_v5, 16  ;;  %v3056_v5 = vld [vmem:[%s3893_s1 + $0xd0] sm:$0xff]  }
 0x2da   :  { %v853_v48 = vadd.f32 %v3605_v44, %v841_v45  ;;  %v2855_v49 = vpop.f32.mrb[11].mxu0  ;;  %v3054_v45 = vld [vmem:[%s3893_s1 + $0x50] sm:$0xff]   ;;  %v1264_v47 = vrot.slane %v1262_v38, 1  ;;  %v3066_v38 = vld [vmem:[%s3893_s1 + $0x68] sm:$0xff]  }
 0x2dc   :  { %v854_v50 = vmax.f32 %v853_v48, 0.0 }
 0x2de   :  { %v2657_v51 = vpack.c.bf16 %v854_v50, %v854_v50  ;;  %v3049_v50 = vld [vmem:[%s3893_s1 + $0x80] sm:$0xff]  }
 0x2e0   :  { %v860_v53 = vshrl.u32 %v2657_v51, 16  ;;  %v863_v56 = vshll.u32 %v2657_v51, 16  ;;  %v3055_v51 = vld [vmem:[%s3893_s1 + $0x10] sm:$0xff]  }
 0x2e2   :  { %v862_v54 = vrot.slane %v860_v53, 7 }
 0x2e4   :  { %v865_v59 = vor.u32 %v863_v56, %v862_v54  ;;  %v3052_v54 = vld [vmem:[%s3893_s1 + $0xc8] sm:$0xff]   ;;  %v3058_v56 = vld [vmem:[%s3893_s1 + $0x58] sm:$0xff]  }
 0x2e6   :  { %v869_v60 = vsel %vm3610_vm9, %v865_v59, %v868_v58  ;;  %v1265_v58 = vor.u32 %v1264_v47, %v1260_v46  ;;  %v3053_v59 = vld [vmem:[%s3893_s1 + $0x88] sm:$0xff]   ;;  %v3065_v46 = vld [vmem:[%s3893_s1 + $0xa0] sm:$0xff]   ;;  %v3071_v47 = vld [vmem:[%s3893_s1 + $0x30] sm:$0xff]  }
 0x2e7   :  { %870 = vst [vmem:[#allocation4] sm:$0x7] %v869_v60  ;;  %v3059_v60 = vld [vmem:[%s3893_s1 + $0x18] sm:$0xff]  }
 0x2ee   :  { %v871_v37 = vld [vmem:[#allocation4] sm:$0x3] }
 0x2ef   :  { %1151 = vmatmul.mubr.bf16.vlgmr.msra.gmra.mrb[12].mxu1 %v871_v37  ;;  %v3048_v40 = vld [vmem:[#allocation4] ss:$0 sps:$4 sm:$0x77]   ;;  %v3060_v37 = vld [vmem:[%s3893_s1 + $0xd8] sm:$0xff]  }
 0x2f0   :  { %2755 = vmatpush3.bf16.msra.mxu1 %v3046_v6  ;;  %1539 = vmatprep.mubr.bf16.mxu1 %v2532_v35  ;;  %v912_v43 = vshll.u32 %v3048_v40, 16  ;;  %v910_v48 = vshrl.u32 %v3048_v40, 16  ;;  %v3062_v6 = vld [vmem:[%s3893_s1 + $0x60] sm:$0xff]   ;;  %v3057_v35 = vld [vmem:[%s3893_s1 + $0x90] sm:$0xff]   ;;  %v3061_v40 = vld [vmem:[%s3893_s1 + $0x98] sm:$0xff]  }
 0x2f1   :  { %2756 = vmatprep.subr.bf16.mxu1 %v3050_v36  ;;  %v3063_v36 = vld [vmem:[%s3893_s1 + $0x20] sm:$0xff]  }
 0x2f2   :  { %v914_v49 = vrot.slane %v912_v43, 1  ;;  %v3064_v43 = vld [vmem:[%s3893_s1 + $0xe0] sm:$0xff]  }
 0x2f4   :  { %2757 = vmatpush3.bf16.msra.mxu1 %v3051_v42  ;;  %v915_v53 = vor.u32 %v914_v49, %v910_v48  ;;  %v3067_v42 = vld [vmem:[%s3893_s1 + $0x28] sm:$0xff]   ;;  %v3074_v49 = vld [vmem:[%s3893_s1 + $0x78] sm:$0xff]  }
 0x2f5   :  { %2758 = vmatprep.subr.bf16.mxu1 %v3054_v45  ;;  %v3070_v45 = vld [vmem:[%s3893_s1 + $0x70] sm:$0xff]   ;;  %v3068_v48 = vld [vmem:[%s3893_s1 + $0xe8] sm:$0xff]  }
 0x2f6   :  { %1030 = vmatmul.mubr.bf16.vlgmr.msra.gmra.mrb[12].mxu0 %v915_v53  ;;  %v3075_v53 = vld [vmem:[%s3893_s1 + $0x38] sm:$0xff]  }
 0x2f7   :  { %2733 = vmatpush3.bf16.msra.mxu0 %v3049_v50  ;;  %1396 = vmatprep.mubr.bf16.mxu0 %v1265_v58  ;;  %v2513_v50 = vcombine.low %v2480_v61, %v2480_v61  ;;  %v3073_v58 = vld [vmem:[%s3893_s1 + $0xb0] sm:$0xff]  }
 0x2f8   :  { %2759 = vmatpush3.bf16.msra.mxu1 %v3055_v51  ;;  %2734 = vmatprep.subr.bf16.mxu0 %v3052_v54  ;;  %v3069_v51 = vld [vmem:[%s3893_s1 + $0xa8] sm:$0xff]   ;;  %v3072_v54 = vld [vmem:[%s3893_s1 + $0xf0] sm:$0xff]  }
 0x2f9   :  { %2760 = vmatprep.subr.bf16.mxu1 %v3058_v56  ;;  %v2531_v56 = vcombine.low %v3622_v62, %v3622_v62  ;;  %v1255_v61 = vshll.u32 %v2513_v50, 16  ;;  %v3079_v62 = vld [vmem:[%s3893_s1 + $0xb8] sm:$0xff]  }
 0x2fb   :  { %2735 = vmatpush3.bf16.msra.mxu0 %v3053_v59  ;;  %v3076_v59 = vld [vmem:[%s3893_s1 + $0xf8] sm:$0xff]  }
 0x2fc   :  { %2761 = vmatpush3.bf16.msra.mxu1 %v3059_v60  ;;  %2736 = vmatprep.subr.bf16.mxu0 %v3056_v5  ;;  %v1253_v60 = vshrl.u32 %v2513_v50, 16  ;;  %v1257_v5 = vrot.slane %v1255_v61, 1  ;;  %v3092_v50 = vld [vmem:[%s3895_s2 + $0x60] sm:$0xff]   ;;  %v3097_v61 = vld [vmem:[%s3895_s2 + $0x78] sm:$0xff]  }
 0x2fd   :  { %2762 = vmatprep.subr.bf16.mxu1 %v3062_v6 }
 0x2fe   :  { %v1258_v6 = vor.u32 %v1257_v5, %v1253_v60 }
 0x2ff   :  { %2737 = vmatpush3.bf16.msra.mxu0 %v3057_v35  ;;  %v3082_v35 = vld [vmem:[%s3895_s2] sm:$0xff]  }
 0x300   :  { %2763 = vmatpush3.bf16.msra.mxu1 %v3063_v36  ;;  %2738 = vmatprep.subr.bf16.mxu0 %v3060_v37  ;;  %v3083_v36 = vld [vmem:[%s3895_s2 + $0x8] sm:$0xff]   ;;  %v3084_v37 = vld [vmem:[%s3895_s2 + $0x40] sm:$0xff]  }
 0x301   :  { %2764 = vmatprep.subr.bf16.mxu1 %v3066_v38  ;;  %v3085_v38 = vld [vmem:[%s3895_s2 + $0x10] sm:$0xff]  }
 0x303   :  { %2739 = vmatpush3.bf16.msra.mxu0 %v3061_v40  ;;  %v3086_v40 = vld [vmem:[%s3895_s2 + $0x48] sm:$0xff]  }
 0x304   :  { %2765 = vmatpush3.bf16.msra.mxu1 %v3067_v42  ;;  %2740 = vmatprep.subr.bf16.mxu0 %v3064_v43  ;;  %v3087_v42 = vld [vmem:[%s3895_s2 + $0x18] sm:$0xff]   ;;  %v39_v43 = vld [vmem:[#allocation2 + $0x4] sm:$0x7] }
 0x305   :  { %2766 = vmatprep.subr.bf16.mxu1 %v3070_v45  ;;  %v40_v45 = vsel %vm3295_vm2, 0, %v39_v43 }
 0x306   :  { %41 = vst [vmem:[#allocation2 + $0x4] sm:$0x7] %v40_v45 }
 0x307   :  { %2741 = vmatpush3.bf16.msra.mxu0 %v3065_v46  ;;  %v3088_v46 = vld [vmem:[%s3895_s2 + $0x50] sm:$0xff]  }
 0x308   :  { %2767 = vmatpush3.bf16.msra.mxu1 %v3071_v47  ;;  %2742 = vmatprep.subr.bf16.mxu0 %v3068_v48  ;;  %v3089_v47 = vld [vmem:[%s3895_s2 + $0x20] sm:$0xff]   ;;  %v3090_v48 = vld [vmem:[%s3895_s2 + $0x58] sm:$0xff]  }
 0x309   :  { %2768 = vmatprep.subr.bf16.mxu1 %v3074_v49  ;;  %v3091_v49 = vld [vmem:[%s3895_s2 + $0x28] sm:$0xff]  }
 0x30b   :  { %2743 = vmatpush3.bf16.msra.mxu0 %v3069_v51  ;;  %v3093_v51 = vld [vmem:[%s3895_s2 + $0x30] sm:$0xff]  }
 0x30c   :  { %2769 = vmatpush3.bf16.msra.mxu1 %v3075_v53  ;;  %2744 = vmatprep.subr.bf16.mxu0 %v3072_v54  ;;  %v3094_v53 = vld [vmem:[%s3895_s2 + $0x68] sm:$0xff]   ;;  %v3095_v54 = vld [vmem:[%s3895_s2 + $0x38] sm:$0xff]  }
 0x30d   :  { %2888 = vmatprep.subr.bf16.mxu1 %v3109_v39 }
 0x30f   :  { %1540 = vmatmul.mubr.bf16.vlgmr.msra.gmra.mrb[16].mxu1 %v2531_v56  ;;  %2745 = vmatpush3.bf16.msra.mxu0 %v3073_v58  ;;  %v3096_v56 = vld [vmem:[%s3895_s2 + $0x70] sm:$0xff]   ;;  %v1161_v58 = vlaneseq }
 0x310   :  { %2904 = vmatprep.mubr.msk.bf16.mxu1 %vm3110_vm3, %v3109_v39  ;;  %2746 = vmatprep.subr.bf16.mxu0 %v3076_v59 }
 0x311   :  { %2889 = vmatpush3.bf16.msra.mxu1 %v3082_v35  ;;  %v3790_v59 = vshrl.u32 %v1161_v58, 7 }
 0x312   :  { %2890 = vmatprep.subr.bf16.mxu1 %v3109_v39 }
 0x313   :  { %2747 = vmatpush3.bf16.msra.mxu0 %v3079_v62  ;;  %v1163_v35 = vsub.s32 0, %v3790_v59 }
 0x314   :  { %2868 = vmatprep.subr.bf16.mxu0 %v3109_v39 }
 0x315   :  { %2891 = vmatpush3.bf16.msra.mxu1 %v3083_v36  ;;  %v1159_v36 = vld [vmem:[%s3901_s8] sm:$0x3] }
 0x316   :  { %1397 = vmatmul.mubr.bf16.vlgmr.msra.gmra.mrb[16].mxu0 %v1258_v6  ;;  %2892 = vmatprep.subr.bf16.mxu1 %v3109_v39 }
 0x317   :  { %2884 = vmatprep.mubr.msk.bf16.mxu0 %vm3110_vm3, %v3109_v39  ;;  %2869 = vmatpush3.bf16.msra.mxu0 %v3084_v37  ;;  %v1167_v37 = vsub.s32 1, %v3790_v59 }
 0x318   :  { %2870 = vmatprep.subr.bf16.mxu0 %v3109_v39 }
 0x319   :  { %2893 = vmatpush3.bf16.msra.mxu1 %v3085_v38  ;;  %v1164_v38 = vrot.slane %v1159_v36, %v1163_v35 }
 0x31a   :  { %2894 = vmatprep.subr.bf16.mxu1 %v3109_v39 }
 0x31b   :  { %2871 = vmatpush3.bf16.msra.mxu0 %v3086_v40 }
 0x31c   :  { %2872 = vmatprep.subr.bf16.mxu0 %v3109_v39 }
 0x31d   :  { %2895 = vmatpush3.bf16.msra.mxu1 %v3087_v42  ;;  %v1168_v42 = vrot.slane %v1159_v36, %v1167_v37 }
 0x31e   :  { %2896 = vmatprep.subr.bf16.mxu1 %v3109_v39 }
 0x31f   :  { %2873 = vmatpush3.bf16.msra.mxu0 %v3088_v46 }
 0x320   :  { %2874 = vmatprep.subr.bf16.mxu0 %v3109_v39 }
 0x321   :  { %2897 = vmatpush3.bf16.msra.mxu1 %v3089_v47 }
 0x322   :  { %2898 = vmatprep.subr.bf16.mxu1 %v3109_v39 }
 0x323   :  { %2875 = vmatpush3.bf16.msra.mxu0 %v3090_v48 }
 0x324   :  { %2876 = vmatprep.subr.bf16.mxu0 %v3109_v39 }
 0x325   :  { %2899 = vmatpush3.bf16.msra.mxu1 %v3091_v49 }
 0x326   :  { %2900 = vmatprep.subr.bf16.mxu1 %v3109_v39 }
 0x327   :  { %2877 = vmatpush3.bf16.msra.mxu0 %v3092_v50 }
 0x328   :  { %2878 = vmatprep.subr.bf16.mxu0 %v3109_v39 }
 0x329   :  { %2901 = vmatpush3.bf16.msra.mxu1 %v3093_v51 }
 0x32a   :  { %2902 = vmatprep.subr.bf16.mxu1 %v3109_v39 }
 0x32b   :  { %2879 = vmatpush3.bf16.msra.mxu0 %v3094_v53 }
 0x32c   :  { %2880 = vmatprep.subr.bf16.mxu0 %v3109_v39 }
 0x32d   :  { %2903 = vmatpush3.bf16.msra.mxu1 %v3095_v54 }
 0x32e   :  { %2920 = vmatprep.subr.bf16.mxu1 %v3109_v39 }
 0x32f   :  { %2881 = vmatpush3.bf16.msra.mxu0 %v3096_v56 }
 0x330   :  { %2882 = vmatprep.subr.bf16.mxu0 %v3109_v39 }
 0x333   :  { %2883 = vmatpush3.bf16.msra.mxu0 %v3097_v61 }
 0x334   :  { %2908 = vmatprep.subr.bf16.mxu0 %v3109_v39 }
 0x3c2   :  { %v1152_v60 = vpop.f32.mrb[12].mxu1 }
 0x3c3   :  { %v1154_v5 = vpop.f32.mrb[13].mxu1 }
 0x3c4   :  { %v1156_v62 = vpop.f32.mrb[14].mxu1 }
 0x3c5   :  { %v1157_v6 = vpop.f32.mrb[15].mxu1 }
 0x3c9   :  { %v1031_v40 = vpop.f32.mrb[12].mxu0 }
 0x3ca   :  { %v1153_v43 = vadd.f32 %v1152_v60, %v1031_v40  ;;  %v1033_v45 = vpop.f32.mrb[13].mxu0 }
 0x3cb   :  { %v1155_v46 = vadd.f32 %v1154_v5, %v1033_v45  ;;  %v1035_v47 = vpop.f32.mrb[14].mxu0 }
 0x3cc   :  { %v1171_v48 = vadd.f32 %v1164_v38, %v1153_v43  ;;  %v1036_v49 = vpop.f32.mrb[15].mxu0 }
 0x3cd   :  { %v1172_v50 = vadd.f32 %v1168_v42, %v1155_v46 }
 0x3ce   :  { %v1173_v51 = vmax.f32 %v1171_v48, 0.0 }
 0x3cf   :  { %v1174_v53 = vmax.f32 %v1172_v50, 0.0 }
 0x3d1   :  { %v1177_v54 = vcombine.low %v1173_v51, %v1174_v53 }
 0x3d3   :  { %1179 = vst [vmem:[%s3902_s9] sm:$0xff] %v1177_v54  ;;  %v3100_v54 = vld [vmem:[%s3897_s3 + $0x8] sm:$0xff]  }
 0x3e2   :  { %v2770_v56 = vpop.f32.mrb[16].mxu1 }
 0x3e3   :  { %v2771_v61 = vpop.f32.mrb[17].mxu1 }
 0x3e4   :  { %v2772_v58 = vadd.f32 %v2771_v61, %v2770_v56  ;;  %v2773_v62 = vpop.f32.mrb[18].mxu1  ;;  %v3101_v56 = vld [vmem:[%s3897_s3 + $0x20] sm:$0xff]   ;;  %v3102_v61 = vld [vmem:[%s3897_s3 + $0x10] sm:$0xff]  }
 0x3e5   :  { %v2774_v6 = vpop.f32.mrb[19].mxu1  ;;  %v3104_v62 = vld [vmem:[%s3897_s3 + $0x18] sm:$0xff]  }
 0x3e6   :  { %v3105_v6 = vld [vmem:[%s3897_s3 + $0x30] sm:$0xff]  }
 0x3e9   :  { %v2748_v36 = vpop.f32.mrb[16].mxu0 }
 0x3ea   :  { %v2749_v60 = vpop.f32.mrb[17].mxu0 }
 0x3eb   :  { %v2750_v40 = vadd.f32 %v2749_v60, %v2748_v36  ;;  %v2751_v5 = vpop.f32.mrb[18].mxu0  ;;  %v3106_v36 = vld [vmem:[%s3897_s3 + $0x38] sm:$0xff]  }
 0x3ec   :  { %v2752_v45 = vpop.f32.mrb[19].mxu0 }
 0x3ed   :  { %v1542_v38 = vadd.f32 %v2772_v58, %v2750_v40  ;;  %v3103_v58 = vld [vmem:[%s3897_s3 + $0x28] sm:$0xff]  }
 0x3ef   :  { %v1554_v42 = vadd.f32 %v3345_v11, %v1542_v38  ;;  %v3099_v11 = vld [vmem:[%s3897_s3] sm:$0xff]  }
 0x3f1   :  { %v1555_v43 = vmax.f32 %v1554_v42, 0.0 }
 0x3f3   :  { %v1556_v46 = vpack.c.bf16 %v1555_v43, %v1555_v43 }
 0x3f5   :  { %1558 = vst [vmem:[#allocation2 + $0x4] sm:$0x3] %v1556_v46 }
 0x3fc   :  { %v1559_v47 = vld [vmem:[#allocation2 + $0x4] sm:$0x3] }
 0x3fd   :  { %2905 = vmatmul.mubr.bf16.vlgmr.msra.gmra.mrb[20].mxu1 %v1559_v47  ;;  %v3098_v48 = vld [vmem:[#allocation2 + $0x4] ss:$0 sps:$4 sm:$0x77]  }
 0x3fe   :  { %2928 = vmatprep.mubr.msk.bf16.mxu1 %vm3110_vm3, %v3109_v39  ;;  %v1599_v49 = vshll.u32 %v3098_v48, 16  ;;  %v1597_v50 = vshrl.u32 %v3098_v48, 16  ;;  %2921 = vmatpush3.bf16.msra.mxu1 %v3099_v11 }
 0x3ff   :  { %2922 = vmatprep.subr.bf16.mxu1 %v3109_v39 }
 0x400   :  { %v1601_v51 = vrot.slane %v1599_v49, 1 }
 0x402   :  { %v1602_v53 = vor.u32 %v1601_v51, %v1597_v50  ;;  %2923 = vmatpush3.bf16.msra.mxu1 %v3100_v54 }
 0x403   :  { %2924 = vmatprep.subr.bf16.mxu1 %v3109_v39 }
 0x404   :  { %2885 = vmatmul.mubr.bf16.vlgmr.msra.gmra.mrb[20].mxu0 %v1602_v53 }
 0x405   :  { %2916 = vmatprep.mubr.msk.bf16.mxu0 %vm3110_vm3, %v3109_v39  ;;  %2909 = vmatpush3.bf16.msra.mxu0 %v3101_v56 }
 0x406   :  { %2925 = vmatpush3.bf16.msra.mxu1 %v3102_v61  ;;  %2910 = vmatprep.subr.bf16.mxu0 %v3109_v39 }
 0x407   :  { %2926 = vmatprep.subr.bf16.mxu1 %v3109_v39 }
 0x409   :  { %2911 = vmatpush3.bf16.msra.mxu0 %v3103_v58 }
 0x40a   :  { %2927 = vmatpush3.bf16.msra.mxu1 %v3104_v62  ;;  %2912 = vmatprep.subr.bf16.mxu0 %v3109_v39 }
 0x40b   :  { %2238 = vmatprep.subr.bf16.mxu1 %v3403_v63 }
 0x40d   :  { %2913 = vmatpush3.bf16.msra.mxu0 %v3105_v6 }
 0x40e   :  { %2914 = vmatprep.subr.bf16.mxu0 %v3109_v39  ;;  %v1802_v39 = vld [vmem:[#allocation3 + $0x4] sm:$0x7] }
 0x411   :  { %2915 = vmatpush3.bf16.msra.mxu0 %v3106_v36 }
 0x412   :  { %2117 = vmatprep.subr.bf16.mxu0 %v3430_v4 }
 0x4d0   :  { %v1774_v60 = vpop.f32.mrb[20].mxu1 }
 0x4d1   :  { %v2906_v40 = vpop.f32.mrb[21].mxu1 }
 0x4d2   :  { %v1777_v5 = vpop.f32.mrb[22].mxu1 }
 0x4d3   :  { %v2907_v45 = vpop.f32.mrb[23].mxu1 }
 0x4d7   :  { %v1686_v38 = vpop.f32.mrb[20].mxu0 }
 0x4d8   :  { %v1775_v42 = vadd.f32 %v1774_v60, %v1686_v38  ;;  %v2886_v43 = vpop.f32.mrb[21].mxu0 }
 0x4d9   :  { %v1689_v46 = vpop.f32.mrb[22].mxu0 }
 0x4da   :  { %v1787_v63 = vadd.f32 %v3387_v41, %v1775_v42  ;;  %v2887_v47 = vpop.f32.mrb[23].mxu0 }
 0x4dc   :  { %v1788_v48 = vmax.f32 %v1787_v63, 0.0 }
 0x4de   :  { %v2658_v49 = vpack.c.bf16 %v1788_v48, %v1788_v48 }
 0x4e0   :  { %v1794_v50 = vshrl.u32 %v2658_v49, 16  ;;  %v1797_v53 = vshll.u32 %v2658_v49, 16 }
 0x4e2   :  { %v1796_v51 = vrot.slane %v1794_v50, 7 }
 0x4e4   :  { %v1799_v11 = vor.u32 %v1797_v53, %v1796_v51 }
 0x4e6   :  { %v1803_v4 = vsel %vm3392_vm7, %v1799_v11, %v1802_v39 }
 0x4e7   :  { %1804 = vst [vmem:[#allocation3 + $0x4] sm:$0x7] %v1803_v4 }
 0x4ee   :  { %v1805_v54 = vld [vmem:[#allocation3 + $0x4] sm:$0x3] }
 0x4ef   :  { %2929 = vmatmul.mubr.msk.bf16.vlgmr.msra.gmra.mrb[24].mxu1 %vm735_vm8, %v1805_v54  ;;  %v3107_v56 = vld [vmem:[#allocation3 + $0x4] ss:$0 sps:$4 sm:$0x77]  }
 0x4f0   :  { %2239 = vmatpush1.bf16.msra.mxu1 %v3408_v0  ;;  %2270 = vmatprep.mubr.bf16.mxu1 %v3111_v32  ;;  %v1829_v41 = vshll.u32 %v3107_v56, 16  ;;  %v1827_v61 = vshrl.u32 %v3107_v56, 16  ;;  %v54_v0 = vsel %vm3295_vm2, 0, %v53_v52 }
 0x4f1   :  { %2240 = vmatprep.subr.bf16.mxu1 %v3415_v1  ;;  %55 = vst [vmem:[#allocation4 + $0x4] sm:$0x7] %v54_v0 }
 0x4f2   :  { %v1831_v58 = vrot.slane %v1829_v41, 1 }
 0x4f4   :  { %2241 = vmatpush1.bf16.msra.mxu1 %v3420_v2  ;;  %v1832_v62 = vor.u32 %v1831_v58, %v1827_v61 }
 0x4f5   :  { %2242 = vmatprep.subr.bf16.mxu1 %v3441_v7 }
 0x4f6   :  { %2917 = vmatmul.mubr.msk.bf16.vlgmr.msra.gmra.mrb[24].mxu0 %vm735_vm8, %v1832_v62 }
 0x4f7   :  { %2118 = vmatpush1.bf16.msra.mxu0 %v3425_v3  ;;  %2149 = vmatprep.mubr.bf16.mxu0 %v3111_v32  ;;  %v2279_v32 = vld [vmem:[%s3901_s8] sm:$0x3] }
 0x4f8   :  { %2243 = vmatpush1.bf16.msra.mxu1 %v3446_v8  ;;  %2119 = vmatprep.subr.bf16.mxu0 %v3452_v9 }
 0x4f9   :  { %2244 = vmatprep.subr.bf16.mxu1 %v3464_v12 }
 0x4fb   :  { %2120 = vmatpush1.bf16.msra.mxu0 %v3458_v10 }
 0x4fc   :  { %2245 = vmatpush1.bf16.msra.mxu1 %v3470_v13  ;;  %2121 = vmatprep.subr.bf16.mxu0 %v3476_v14 }
 0x4fd   :  { %2246 = vmatprep.subr.bf16.mxu1 %v3488_v16 }
 0x4ff   :  { %2122 = vmatpush1.bf16.msra.mxu0 %v3482_v15 }
 0x500   :  { %2247 = vmatpush1.bf16.msra.mxu1 %v3494_v17  ;;  %2123 = vmatprep.subr.bf16.mxu0 %v3500_v18 }
 0x501   :  { %2248 = vmatprep.subr.bf16.mxu1 %v3512_v20  ;;  %v1989_v20 = vld [vmem:[#allocation4 + $0x4] sm:$0x7] }
 0x503   :  { %2124 = vmatpush1.bf16.msra.mxu0 %v3506_v19 }
 0x504   :  { %2249 = vmatpush1.bf16.msra.mxu1 %v3518_v21  ;;  %2125 = vmatprep.subr.bf16.mxu0 %v3524_v22 }
 0x505   :  { %2250 = vmatprep.subr.bf16.mxu1 %v3536_v24 }
 0x507   :  { %2126 = vmatpush1.bf16.msra.mxu0 %v3530_v23 }
 0x508   :  { %2251 = vmatpush1.bf16.msra.mxu1 %v3542_v25  ;;  %2127 = vmatprep.subr.bf16.mxu0 %v3553_v27 }
 0x509   :  { %2252 = vmatprep.subr.bf16.mxu1 %v3564_v29 }
 0x50b   :  { %2128 = vmatpush1.bf16.msra.mxu0 %v3548_v26 }
 0x50c   :  { %2253 = vmatpush1.bf16.msra.mxu1 %v3559_v28  ;;  %2129 = vmatprep.subr.bf16.mxu0 %v3569_v30 }
 0x50f   :  { %2130 = vmatpush1.bf16.msra.mxu0 %v3577_v31 }
 0x510   :  { %2131 = vmatprep.subr.bf16.mxu0 %v3592_v34 }
 0x513   :  { %2132 = vmatpush1.bf16.msra.mxu0 %v3587_v33  ;;  %v2284_v33 = vrot.slane %v2279_v32, %v1163_v35 }
 0x5c2   :  { %v1961_v1 = vpop.f32.mrb[24].mxu1 }
 0x5c3   :  { %v2930_v2 = vpop.f32.mrb[25].mxu1 }
 0x5c4   :  { %v1964_v3 = vpop.f32.mrb[26].mxu1 }
 0x5c5   :  { %v2931_v7 = vpop.f32.mrb[27].mxu1 }
 0x5c9   :  { %v1894_v8 = vpop.f32.mrb[24].mxu0 }
 0x5ca   :  { %v1962_v9 = vadd.f32 %v1961_v1, %v1894_v8  ;;  %v2918_v10 = vpop.f32.mrb[25].mxu0 }
 0x5cb   :  { %v1897_v12 = vpop.f32.mrb[26].mxu0 }
 0x5cc   :  { %v1974_v13 = vadd.f32 %v3605_v44, %v1962_v9  ;;  %v2919_v14 = vpop.f32.mrb[27].mxu0  ;;  %v2288_v44 = vrot.slane %v2279_v32, %v1167_v37 }
 0x5ce   :  { %v1975_v15 = vmax.f32 %v1974_v13, 0.0 }
 0x5d0   :  { %v2659_v16 = vpack.c.bf16 %v1975_v15, %v1975_v15 }
 0x5d2   :  { %v1981_v17 = vshrl.u32 %v2659_v16, 16  ;;  %v1984_v19 = vshll.u32 %v2659_v16, 16 }
 0x5d4   :  { %v1983_v18 = vrot.slane %v1981_v17, 7 }
 0x5d6   :  { %v1986_v55 = vor.u32 %v1984_v19, %v1983_v18 }
 0x5d8   :  { %v1990_v21 = vsel %vm3610_vm9, %v1986_v55, %v1989_v20 }
 0x5d9   :  { %1991 = vst [vmem:[#allocation4 + $0x4] sm:$0x7] %v1990_v21 }
 0x5e0   :  { %v1992_v22 = vld [vmem:[#allocation4 + $0x4] sm:$0x3] }
 0x5e1   :  { %2271 = vmatmul.mubr.bf16.vlgmr.msra.gmra.mrb[28].mxu1 %v1992_v22  ;;  %v3108_v23 = vld [vmem:[#allocation4 + $0x4] ss:$0 sps:$4 sm:$0x77]  }
 0x5e2   :  { %v2032_v24 = vshll.u32 %v3108_v23, 16  ;;  %v2030_v25 = vshrl.u32 %v3108_v23, 16 }
 0x5e4   :  { %v2034_v26 = vrot.slane %v2032_v24, 1 }
 0x5e6   :  { %v2035_v27 = vor.u32 %v2034_v26, %v2030_v25 }
 0x5e8   :  { %2150 = vmatmul.mubr.bf16.vlgmr.msra.gmra.mrb[28].mxu0 %v2035_v27 }
 0x6b4   :  { %v2272_v28 = vpop.f32.mrb[28].mxu1 }
 0x6b5   :  { %v2274_v29 = vpop.f32.mrb[29].mxu1 }
 0x6b6   :  { %v2276_v30 = vpop.f32.mrb[30].mxu1 }
 0x6b7   :  { %v2277_v31 = vpop.f32.mrb[31].mxu1 }
 0x6bb   :  { %v2151_v34 = vpop.f32.mrb[28].mxu0 }
 0x6bc   :  { %v2273_v57 = vadd.f32 %v2272_v28, %v2151_v34  ;;  %v2153_v6 = vpop.f32.mrb[29].mxu0 }
 0x6bd   :  { %v2275_v36 = vadd.f32 %v2274_v29, %v2153_v6  ;;  %v2155_v60 = vpop.f32.mrb[30].mxu0 }
 0x6be   :  { %v2291_v40 = vadd.f32 %v2284_v33, %v2273_v57  ;;  %v2156_v5 = vpop.f32.mrb[31].mxu0 }
 0x6bf   :  { %v2292_v45 = vadd.f32 %v2288_v44, %v2275_v36 }
 0x6c0   :  { %v2293_v38 = vmax.f32 %v2291_v40, 0.0 }
 0x6c1   :  { %v2294_v42 = vmax.f32 %v2292_v45, 0.0 }
 0x6c3   :  { %v2297_v43 = vcombine.low %v2293_v38, %v2294_v42 }
 0x6c5   :  { %2655 = vst [vmem:[%s3902_s9 + $0x8] sm:$0xff] %v2297_v43 }

</bundles_post_ra>
